<compile_context>
chip_gen: v7x
topology: tpu7x:2x2x1
jax: 0.10.0
libtpu: 0.0.40
codegen_flags: <defaults>
</compile_context>

<pallas_src>
import jax
import jax.numpy as jnp
from jax import lax
from jax.experimental import pallas as pl
from jax.experimental.pallas import tpu as pltpu

LANE = 128  # TPU lane width; hidden/output dims are padded to a multiple of this.


def tweetnet_kernel(x_ref, len_ref, w_ih_ref, w_hh_ref, b_ref, w_cls_ref,
                    b_cls_ref, out_ref, xp_ref, h_ref, c_ref, acc_ref):
    """One grid step = T_TILE timesteps of the LSTM recurrence.

    x_ref   : (T_TILE*B, E)   bf16  time-major embedding rows for this tile
    len_ref : (B, 1)          f32   sequence lengths
    w_ih    : (E, 4*Hp)       bf16  input->gates, gate order [i, f, o, g]
    w_hh    : (Hp, 4*Hp)      bf16  hidden->gates, gate order [i, f, o, g]
    b       : (1, 4*Hp)       f32   b_ih + b_hh, gate order [i, f, o, g]
    w_cls   : (Hp, Op)        bf16  classifier weights (lane padded)
    b_cls   : (1, Op)         f32
    out_ref : (B, Op)         f32   lane-dense logits slab (sliced to O outside)
    xp_ref  : (T_TILE*B, 4Hp) f32   scratch: hoisted input projection
    h/c/acc : (B, Hp)         f32   scratch carries, persist across grid steps
    """
    t_blk = pl.program_id(0)
    n_blk = pl.num_programs(0)
    B = len_ref.shape[0]
    Hp = w_hh_ref.shape[0]
    T_TILE = x_ref.shape[0] // B

    @pl.when(t_blk == 0)
    def _():
        h_ref[...] = jnp.zeros_like(h_ref)
        c_ref[...] = jnp.zeros_like(c_ref)
        acc_ref[...] = jnp.zeros_like(acc_ref)

    # Hoisted input projection: one large MXU matmul for the whole time tile
    # (M = T_TILE*B rows) instead of T tiny (B,E)x(E,4Hp) matmuls inside the
    # recurrence. Kept in VMEM scratch: at this tile size the value would
    # exceed ~16 vregs if held live across the unrolled loop.
    xp_ref[...] = (
        jnp.dot(x_ref[...], w_ih_ref[...], preferred_element_type=jnp.float32)
        + b_ref[...])

    lengths = len_ref[...]            # (B, 1) f32

    def step(s, carry):
        h, c, acc = carry
        row = pl.multiple_of(s * B, B)
        g_x = xp_ref[pl.ds(row, B), :]                          # (B, 4Hp) f32
        # RHS streamed from VMEM each step — do NOT hoist w_hh into a value
        # (at realistic Hp it pins the whole vreg file and forces spills).
        gates = g_x + jnp.dot(h.astype(jnp.bfloat16), w_hh_ref[...],
                              preferred_element_type=jnp.float32)
        # Gate order after wrapper-side permutation: [i, f, o, g].
        # Sigmoid over the contiguous first 3*Hp lanes, tanh over the last Hp;
        # no transcendental work is discarded and all slices are lane-aligned.
        sg = jax.nn.sigmoid(gates[:, :3 * Hp])
        g = jnp.tanh(gates[:, 3 * Hp:])
        i = sg[:, 0 * Hp:1 * Hp]
        f = sg[:, 1 * Hp:2 * Hp]
        o = sg[:, 2 * Hp:3 * Hp]
        c_new = f * c + i * g
        h_new = o * jnp.tanh(c_new)
        # pad_packed_sequence zeroes outputs for t >= length.
        # (f32 compare is exact while T < 2^24 — always true for tweets.)
        t_glob = (t_blk * T_TILE + s).astype(jnp.float32)
        mask = (t_glob < lengths).astype(jnp.float32)           # (B, 1)
        return h_new, c_new, acc + mask * h_new

    h, c, acc = lax.fori_loop(
        0, T_TILE, step, (h_ref[...], c_ref[...], acc_ref[...]), unroll=True)
    h_ref[...] = h
    c_ref[...] = c
    acc_ref[...] = acc

    @pl.when(t_blk == n_blk - 1)
    def _():
        # Exact reciprocal kept so the bf16-mirrored reference matches tightly;
        # approx=True would move the divide to the otherwise-idle EUP slot.
        seq_emb = acc_ref[...] * pl.reciprocal(lengths, approx=False)   # (B, Hp)
        logits = jax.nn.sigmoid(
            jnp.dot(seq_emb.astype(jnp.bfloat16), w_cls_ref[...],
                    preferred_element_type=jnp.float32) + b_cls_ref[...])
        out_ref[...] = logits.astype(out_ref.dtype)


# PyTorch LSTM gate order is [i, f, g, o]; the kernel wants [i, f, o, g] so the
# three sigmoid gates are contiguous. Applied identically to w_ih, w_hh, bias.
_GATE_PERM = (0, 1, 3, 2)


def _prep_gate_blocks(w, h, hp):
    """(..., 4h) -> (..., 4hp): permute gates to [i,f,o,g], pad each block to hp.

    NOTE: the padded gate columns MUST stay zero (weights and bias): together
    with zero-initialized h/c this keeps the padded hidden lanes exactly 0.
    """
    lead = w.shape[:-1]
    w4 = w.reshape(lead + (4, h))[..., _GATE_PERM, :]
    pad = [(0, 0)] * len(lead) + [(0, 0), (0, hp - h)]
    return jnp.pad(w4, pad).reshape(lead + (4 * hp,))


def tweetnet_forward(input_ids, lengths, params, *, t_tile=None):
    """JAX glue: time-major embedding gather + padding, then one Pallas call."""
    emb_table = params["embedding"]               # (V+2, E) f32
    B, T = input_ids.shape
    E = emb_table.shape[1]
    H = params["w_hh"].shape[0]
    O = params["w_cls"].shape[1]
    Hp = ((H + LANE - 1) // LANE) * LANE          # lane-aligned hidden (128)
    Op = ((O + LANE - 1) // LANE) * LANE          # lane-dense output slab (128)
    pad_id = emb_table.shape[0] - 1               # a zero embedding row

    # Mean pooling / pack_padded_sequence require every length >= 1; a zero
    # length would make the divide produce inf/nan (PyTorch rejects it too).

    if t_tile is None:
        # Fill the hoisted-projection M dim (~256 rows saturates the 256-wide
        # v6e/v7x MXU; also >= 128 for v5e) and amortize the ~0.35 us/step grid
        # overhead, subject to a VMEM cap on xp + double-buffered embeds tile.
        target_rows = 256
        t_tile = max(1, -(-target_rows // B))
        per_step_bytes = B * (4 * Hp * 4 + 2 * E * 2)
        t_tile = min(t_tile, max(1, (8 << 20) // per_step_bytes), T)

    # Pad T to a multiple of the time tile; padded steps satisfy t >= length
    # for every sequence, so the mask drops them from the sum.
    n_t = pl.cdiv(T, t_tile)
    T_pad = n_t * t_tile

    # Gather directly in time-major (T, B, E) order (no HBM transpose of the
    # big activation slab), cast to bf16, flatten to t-major rows.
    ids_tb = jnp.pad(input_ids.T, ((0, T_pad - T), (0, 0)),
                     constant_values=pad_id)                    # (T_pad, B)
    embeds = emb_table[ids_tb].astype(jnp.bfloat16)             # (T_pad, B, E)
    embeds_2d = embeds.reshape(T_pad * B, E)                    # (T_pad*B, E)

    # Weights in "activations @ weights" form; gate blocks permuted to
    # [i, f, o, g] and padded to Hp lanes; matmul operands bf16, biases f32
    # (accumulation is f32 in the kernel).
    w_ih = _prep_gate_blocks(params["w_ih"], H, Hp).astype(jnp.bfloat16)  # (E, 4Hp)
    w_hh = jnp.pad(_prep_gate_blocks(params["w_hh"], H, Hp),
                   ((0, Hp - H), (0, 0))).astype(jnp.bfloat16)            # (Hp, 4Hp)
    bias = _prep_gate_blocks((params["b_ih"] + params["b_hh"])[None, :],
                             H, Hp)                                       # (1, 4Hp)
    w_cls = jnp.pad(params["w_cls"],
                    ((0, Hp - H), (0, Op - O))).astype(jnp.bfloat16)      # (Hp, Op)
    b_cls = jnp.pad(params["b_cls"], (0, Op - O))[None, :]                # (1, Op)
    lengths_f = lengths.astype(jnp.float32)[:, None]                      # (B, 1)

    tb = t_tile * B

    # Explicit VMEM budget so production tiles survive v5e's 16 MiB scoped
    # default and v7x's 64 MiB physical VMEM.
    vmem_needed = (
        2 * tb * E * 2                                        # embeds tile (x2 buf)
        + 2 * (E * 4 * Hp + Hp * 4 * Hp + Hp * Op) * 2        # bf16 weights (x2 buf)
        + 2 * (4 * Hp + Op + B) * 4                           # biases + lengths
        + 2 * B * Op * 4                                      # output block
        + tb * 4 * Hp * 4                                     # xp scratch
        + 3 * B * Hp * 4)                                     # h/c/acc carries
    vmem_limit = int(min(max(2 * vmem_needed, 16 << 20), 64 << 20))

    grid_spec = pltpu.PrefetchScalarGridSpec(
        num_scalar_prefetch=0,
        grid=(n_t,),
        in_specs=[
            pl.BlockSpec((tb, E), lambda t: (t, 0)),        # embeds tile (double-buffered)
            pl.BlockSpec((B, 1), lambda t: (0, 0)),          # lengths
            pl.BlockSpec((E, 4 * Hp), lambda t: (0, 0)),     # w_ih
            pl.BlockSpec((Hp, 4 * Hp), lambda t: (0, 0)),    # w_hh
            pl.BlockSpec((1, 4 * Hp), lambda t: (0, 0)),     # bias
            pl.BlockSpec((Hp, Op), lambda t: (0, 0)),        # w_cls
            pl.BlockSpec((1, Op), lambda t: (0, 0)),         # b_cls
        ],
        out_specs=pl.BlockSpec((B, Op), lambda t: (0, 0)),
        scratch_shapes=[
            pltpu.VMEM((tb, 4 * Hp), jnp.float32),   # hoisted input projection
            pltpu.VMEM((B, Hp), jnp.float32),        # h carry
            pltpu.VMEM((B, Hp), jnp.float32),        # c carry
            pltpu.VMEM((B, Hp), jnp.float32),        # masked sum of h
        ],
    )
    out = pl.pallas_call(
        tweetnet_kernel,
        out_shape=jax.ShapeDtypeStruct((B, Op), jnp.float32),
        grid_spec=grid_spec,
        compiler_params=pltpu.CompilerParams(
            # Time axis carries the recurrence -> sequential.
            dimension_semantics=("arbitrary",),
            vmem_limit_bytes=vmem_limit,
        ),
    )(embeds_2d, lengths_f, w_ih, w_hh, bias, w_cls, b_cls)
    return out[:, :O]


def tweetnet_reference(input_ids, lengths, params):
    """Pure-JAX reference mirroring the kernel's bf16-matmul / f32-accumulate math."""
    x = params["embedding"][input_ids].astype(jnp.bfloat16)      # (B, T, E)
    H = params["w_hh"].shape[0]
    w_ih = params["w_ih"].astype(jnp.bfloat16)
    w_hh = params["w_hh"].astype(jnp.bfloat16)
    bias = (params["b_ih"] + params["b_hh"])[None, :]
    w_cls = params["w_cls"].astype(jnp.bfloat16)
    b_cls = params["b_cls"][None, :]
    B, T, _ = x.shape

    def cell(carry, x_t):
        h, c = carry
        xp = jnp.dot(x_t, w_ih, preferred_element_type=jnp.float32) + bias
        gates = xp + jnp.dot(h.astype(jnp.bfloat16), w_hh,
                             preferred_element_type=jnp.float32)
        i = jax.nn.sigmoid(gates[:, 0 * H:1 * H])
        f = jax.nn.sigmoid(gates[:, 1 * H:2 * H])
        g = jnp.tanh(gates[:, 2 * H:3 * H])
        o = jax.nn.sigmoid(gates[:, 3 * H:4 * H])
        c_new = f * c + i * g
        h_new = o * jnp.tanh(c_new)
        return (h_new, c_new), h_new

    init = (jnp.zeros((B, H), jnp.float32), jnp.zeros((B, H), jnp.float32))
    _, hs = lax.scan(cell, init, jnp.transpose(x, (1, 0, 2)))    # (T, B, H)
    mask = (jnp.arange(T)[:, None] < lengths[None, :]).astype(jnp.float32)  # (T, B)
    summed = jnp.sum(hs * mask[:, :, None], axis=0)              # (B, H)
    seq = summed * (1.0 / lengths.astype(jnp.float32))[:, None]
    return jax.nn.sigmoid(
        jnp.dot(seq.astype(jnp.bfloat16), w_cls,
                preferred_element_type=jnp.float32) + b_cls)


def init_params(key, vocab_size, emb_dim, hidden_size, output_size):
    ks = jax.random.split(key, 7)
    k_lstm = 1.0 / jnp.sqrt(hidden_size)
    emb = jax.random.normal(ks[0], (vocab_size, emb_dim), jnp.float32) * 0.1
    # two extra zero rows, mirroring load_pretrained_embedding's added pad vectors
    emb = jnp.concatenate([emb, jnp.zeros((2, emb_dim), jnp.float32)], axis=0)
    u = lambda k, shape, s: jax.random.uniform(k, shape, jnp.float32, -s, s)
    return {
        "embedding": emb,                                          # (V+2, E)
        "w_ih": u(ks[1], (emb_dim, 4 * hidden_size), k_lstm),      # (E, 4H)
        "w_hh": u(ks[2], (hidden_size, 4 * hidden_size), k_lstm),  # (H, 4H)
        "b_ih": u(ks[3], (4 * hidden_size,), k_lstm),
        "b_hh": u(ks[4], (4 * hidden_size,), k_lstm),
        "w_cls": u(ks[5], (hidden_size, output_size),
                   1.0 / jnp.sqrt(hidden_size)),                   # (H, O)
        "b_cls": u(ks[6], (output_size,), 1.0 / jnp.sqrt(hidden_size)),
    }


if __name__ == "__main__":
    VOCAB, EMB, HIDDEN, OUT = 100, 32, 32, 4
    B, T = 8, 8

    key = jax.random.PRNGKey(0)
    k_par, k_ids, k_len = jax.random.split(key, 3)
    params = init_params(k_par, VOCAB, EMB, HIDDEN, OUT)

    lengths = jax.random.randint(k_len, (B,), 1, T + 1, jnp.int32)
    lengths = lengths.at[0].set(T)   # mimic pack_padded: max length present
    ids = jax.random.randint(k_ids, (B, T), 0, VOCAB, jnp.int32)
    pad_mask = jnp.arange(T)[None, :] >= lengths[:, None]
    input_ids = jnp.where(pad_mask, VOCAB, ids)      # pad token -> zero embedding row

    logits = jax.block_until_ready(tweetnet_forward(input_ids, lengths, params))
    ref = jax.block_until_ready(tweetnet_reference(input_ids, lengths, params))

    assert logits.shape == (B, OUT) and logits.dtype == jnp.float32
    assert bool(jnp.all(jnp.isfinite(logits)))
    assert jnp.allclose(logits, ref, atol=1e-4, rtol=1e-4)
    print("KERNEL_OK")
</pallas_src>

<mosaic_0001>
module attributes {stable_mosaic.version = 11 : i64} {
  func.func @tweetnet_kernel(%arg0: i32, %arg1: memref<64x32xbf16, #tpu.memory_space<vmem>>, %arg2: memref<8x1xf32, #tpu.memory_space<vmem>>, %arg3: memref<32x512xbf16, #tpu.memory_space<vmem>>, %arg4: memref<128x512xbf16, #tpu.memory_space<vmem>>, %arg5: memref<1x512xf32, #tpu.memory_space<vmem>>, %arg6: memref<128x128xbf16, #tpu.memory_space<vmem>>, %arg7: memref<1x128xf32, #tpu.memory_space<vmem>>, %arg8: memref<8x128xf32, #tpu.memory_space<vmem>>, %arg9: memref<64x512xf32, #tpu.memory_space<vmem>>, %arg10: memref<8x128xf32, #tpu.memory_space<vmem>>, %arg11: memref<8x128xf32, #tpu.memory_space<vmem>>, %arg12: memref<8x128xf32, #tpu.memory_space<vmem>>) attributes {dimension_semantics = [#tpu.dimension_semantics<arbitrary>], iteration_bounds = array<i64: 1>, scalar_prefetch = 0 : i64, scratch_operands = 4 : i64, tpu.core_type = #tpu.core_type<tc>, window_params = [{transform_indices = @transform_0, window_bounds = array<i64: 64, 32>}, {pipeline_mode = #tpu.pipeline_mode<synchronous>, transform_indices = @transform_1, window_bounds = array<i64: 8, 1>}, {pipeline_mode = #tpu.pipeline_mode<synchronous>, transform_indices = @transform_2, window_bounds = array<i64: 32, 512>}, {pipeline_mode = #tpu.pipeline_mode<synchronous>, transform_indices = @transform_3, window_bounds = array<i64: 128, 512>}, {pipeline_mode = #tpu.pipeline_mode<synchronous>, transform_indices = @transform_4, window_bounds = array<i64: 1, 512>}, {pipeline_mode = #tpu.pipeline_mode<synchronous>, transform_indices = @transform_5, window_bounds = array<i64: 128, 128>}, {pipeline_mode = #tpu.pipeline_mode<synchronous>, transform_indices = @transform_6, window_bounds = array<i64: 1, 128>}, {pipeline_mode = #tpu.pipeline_mode<synchronous>, transform_indices = @transform_7, window_bounds = array<i64: 8, 128>}]} {
    %c0_i32 = arith.constant 0 : i32
    %0 = arith.cmpi eq, %arg0, %c0_i32 : i32
    %1 = arith.extui %0 : i1 to i32
    %c0_i32_0 = arith.constant 0 : i32
    %2 = arith.cmpi ne, %1, %c0_i32_0 : i32
    scf.if %2 {
      %cst_81 = arith.constant 0.000000e+00 : f32
      %292 = vector.broadcast %cst_81 : f32 to vector<8x128xf32>
      %c0_82 = arith.constant 0 : index
      %c0_83 = arith.constant 0 : index
      %293 = vector.load %arg10[%c0_82, %c0_83] : memref<8x128xf32, #tpu.memory_space<vmem>>, vector<8x128xf32>
      tpu.vector_store %arg10[%c0_82, %c0_83], %292 {strides = array<i32>} : memref<8x128xf32, #tpu.memory_space<vmem>>, vector<8x128xf32>,
      %cst_84 = arith.constant 0.000000e+00 : f32
      %294 = vector.broadcast %cst_84 : f32 to vector<8x128xf32>
      %c0_85 = arith.constant 0 : index
      %c0_86 = arith.constant 0 : index
      %295 = vector.load %arg11[%c0_85, %c0_86] : memref<8x128xf32, #tpu.memory_space<vmem>>, vector<8x128xf32>
      tpu.vector_store %arg11[%c0_85, %c0_86], %294 {strides = array<i32>} : memref<8x128xf32, #tpu.memory_space<vmem>>, vector<8x128xf32>,
      %cst_87 = arith.constant 0.000000e+00 : f32
      %296 = vector.broadcast %cst_87 : f32 to vector<8x128xf32>
      %c0_88 = arith.constant 0 : index
      %c0_89 = arith.constant 0 : index
      %297 = vector.load %arg12[%c0_88, %c0_89] : memref<8x128xf32, #tpu.memory_space<vmem>>, vector<8x128xf32>
      tpu.vector_store %arg12[%c0_88, %c0_89], %296 {strides = array<i32>} : memref<8x128xf32, #tpu.memory_space<vmem>>, vector<8x128xf32>,
    } else {
    }
    %c0 = arith.constant 0 : index
    %c0_1 = arith.constant 0 : index
    %3 = vector.load %arg1[%c0, %c0_1] : memref<64x32xbf16, #tpu.memory_space<vmem>>, vector<64x32xbf16>
    %c0_2 = arith.constant 0 : index
    %c0_3 = arith.constant 0 : index
    %4 = vector.load %arg3[%c0_2, %c0_3] : memref<32x512xbf16, #tpu.memory_space<vmem>>, vector<32x512xbf16>
    %cst = arith.constant dense<0.000000e+00> : vector<64x512xf32>
    %5 = tpu.matmul %3, %4, %cst {dimension_numbers = #tpu.dot_dimension_numbers<[1], [0], [0], [1], [0, 0, 1, 1], [], []>} : vector<64x32xbf16>, vector<32x512xbf16>, vector<64x512xf32> -> vector<64x512xf32>
    %c0_4 = arith.constant 0 : index
    %c0_5 = arith.constant 0 : index
    %6 = vector.load %arg5[%c0_4, %c0_5] : memref<1x512xf32, #tpu.memory_space<vmem>>, vector<1x512xf32>
    %7 = vector.broadcast %6 : vector<1x512xf32> to vector<64x512xf32>
    %8 = arith.addf %5, %7 : vector<64x512xf32>
    %c0_6 = arith.constant 0 : index
    %c0_7 = arith.constant 0 : index
    %9 = vector.load %arg9[%c0_6, %c0_7] : memref<64x512xf32, #tpu.memory_space<vmem>>, vector<64x512xf32>
    tpu.vector_store %arg9[%c0_6, %c0_7], %8 {strides = array<i32>} : memref<64x512xf32, #tpu.memory_space<vmem>>, vector<64x512xf32>,
    %c0_8 = arith.constant 0 : index
    %c0_9 = arith.constant 0 : index
    %10 = vector.load %arg2[%c0_8, %c0_9] : memref<8x1xf32, #tpu.memory_space<vmem>>, vector<8x1xf32>
    %c0_10 = arith.constant 0 : index
    %c0_11 = arith.constant 0 : index
    %11 = vector.load %arg10[%c0_10, %c0_11] : memref<8x128xf32, #tpu.memory_space<vmem>>, vector<8x128xf32>
    %c0_12 = arith.constant 0 : index
    %c0_13 = arith.constant 0 : index
    %12 = vector.load %arg11[%c0_12, %c0_13] : memref<8x128xf32, #tpu.memory_space<vmem>>, vector<8x128xf32>
    %c0_14 = arith.constant 0 : index
    %c0_15 = arith.constant 0 : index
    %13 = vector.load %arg12[%c0_14, %c0_15] : memref<8x128xf32, #tpu.memory_space<vmem>>, vector<8x128xf32>
    %c0_i32_16 = arith.constant 0 : i32
    %c8_i32 = arith.constant 8 : i32
    %14 = arith.muli %c0_i32_16, %c8_i32 : i32
    %15 = tpu.assume_multiple %14, 8 : i32
    %16 = arith.index_cast %15 : i32 to index
    %c0_17 = arith.constant 0 : index
    %17 = vector.load %arg9[%16, %c0_17] : memref<64x512xf32, #tpu.memory_space<vmem>>, vector<8x512xf32>
    %18 = arith.truncf %11 : vector<8x128xf32> to vector<8x128xbf16>
    %c0_18 = arith.constant 0 : index
    %c0_19 = arith.constant 0 : index
    %19 = vector.load %arg4[%c0_18, %c0_19] : memref<128x512xbf16, #tpu.memory_space<vmem>>, vector<128x512xbf16>
    %cst_20 = arith.constant dense<0.000000e+00> : vector<8x512xf32>
    %20 = tpu.matmul %18, %19, %cst_20 {dimension_numbers = #tpu.dot_dimension_numbers<[1], [0], [0], [1], [0, 0, 1, 1], [], []>} : vector<8x128xbf16>, vector<128x512xbf16>, vector<8x512xf32> -> vector<8x512xf32>
    %21 = arith.addf %17, %20 : vector<8x512xf32>
    %22 = vector.extract_strided_slice %21 {offsets = [0, 0], sizes = [8, 384], strides = [1, 1]} : vector<8x512xf32> to vector<8x384xf32>
    %23 = arith.negf %22 : vector<8x384xf32>
    %24 = math.exp %23 : vector<8x384xf32>
    %cst_21 = arith.constant 1.000000e+00 : f32
    %25 = vector.broadcast %cst_21 : f32 to vector<8x384xf32>
    %26 = arith.addf %25, %24 : vector<8x384xf32>
    %27 = arith.divf %25, %26 : vector<8x384xf32>
    %28 = vector.extract_strided_slice %21 {offsets = [0, 384], sizes = [8, 128], strides = [1, 1]} : vector<8x512xf32> to vector<8x128xf32>
    %29 = math.tanh %28 : vector<8x128xf32>
    %30 = vector.extract_strided_slice %27 {offsets = [0, 0], sizes = [8, 128], strides = [1, 1]} : vector<8x384xf32> to vector<8x128xf32>
    %31 = vector.extract_strided_slice %27 {offsets = [0, 128], sizes = [8, 128], strides = [1, 1]} : vector<8x384xf32> to vector<8x128xf32>
    %32 = vector.extract_strided_slice %27 {offsets = [0, 256], sizes = [8, 128], strides = [1, 1]} : vector<8x384xf32> to vector<8x128xf32>
    %33 = arith.mulf %31, %12 : vector<8x128xf32>
    %34 = arith.mulf %30, %29 : vector<8x128xf32>
    %35 = arith.addf %33, %34 : vector<8x128xf32>
    %36 = math.tanh %35 : vector<8x128xf32>
    %37 = arith.mulf %32, %36 : vector<8x128xf32>
    %c8_i32_22 = arith.constant 8 : i32
    %38 = arith.muli %arg0, %c8_i32_22 : i32
    %39 = arith.addi %38, %c0_i32_16 : i32
    %40 = arith.sitofp %39 : i32 to f32
    %41 = vector.broadcast %40 : f32 to vector<8x1xf32>
    %42 = arith.cmpf olt, %41, %10 : vector<8x1xf32>
    %43 = arith.extui %42 : vector<8x1xi1> to vector<8x1xi32>
    %44 = arith.sitofp %43 : vector<8x1xi32> to vector<8x1xf32>
    %45 = vector.broadcast %44 : vector<8x1xf32> to vector<8x128xf32>
    %46 = arith.mulf %45, %37 : vector<8x128xf32>
    %47 = arith.addf %13, %46 : vector<8x128xf32>
    %c1_i32 = arith.constant 1 : i32
    %c8_i32_23 = arith.constant 8 : i32
    %48 = arith.muli %c1_i32, %c8_i32_23 : i32
    %49 = tpu.assume_multiple %48, 8 : i32
    %50 = arith.index_cast %49 : i32 to index
    %c0_24 = arith.constant 0 : index
    %51 = vector.load %arg9[%50, %c0_24] : memref<64x512xf32, #tpu.memory_space<vmem>>, vector<8x512xf32>
    %52 = arith.truncf %37 : vector<8x128xf32> to vector<8x128xbf16>
    %c0_25 = arith.constant 0 : index
    %c0_26 = arith.constant 0 : index
    %53 = vector.load %arg4[%c0_25, %c0_26] : memref<128x512xbf16, #tpu.memory_space<vmem>>, vector<128x512xbf16>
    %cst_27 = arith.constant dense<0.000000e+00> : vector<8x512xf32>
    %54 = tpu.matmul %52, %53, %cst_27 {dimension_numbers = #tpu.dot_dimension_numbers<[1], [0], [0], [1], [0, 0, 1, 1], [], []>} : vector<8x128xbf16>, vector<128x512xbf16>, vector<8x512xf32> -> vector<8x512xf32>
    %55 = arith.addf %51, %54 : vector<8x512xf32>
    %56 = vector.extract_strided_slice %55 {offsets = [0, 0], sizes = [8, 384], strides = [1, 1]} : vector<8x512xf32> to vector<8x384xf32>
    %57 = arith.negf %56 : vector<8x384xf32>
    %58 = math.exp %57 : vector<8x384xf32>
    %cst_28 = arith.constant 1.000000e+00 : f32
    %59 = vector.broadcast %cst_28 : f32 to vector<8x384xf32>
    %60 = arith.addf %59, %58 : vector<8x384xf32>
    %61 = arith.divf %59, %60 : vector<8x384xf32>
    %62 = vector.extract_strided_slice %55 {offsets = [0, 384], sizes = [8, 128], strides = [1, 1]} : vector<8x512xf32> to vector<8x128xf32>
    %63 = math.tanh %62 : vector<8x128xf32>
    %64 = vector.extract_strided_slice %61 {offsets = [0, 0], sizes = [8, 128], strides = [1, 1]} : vector<8x384xf32> to vector<8x128xf32>
    %65 = vector.extract_strided_slice %61 {offsets = [0, 128], sizes = [8, 128], strides = [1, 1]} : vector<8x384xf32> to vector<8x128xf32>
    %66 = vector.extract_strided_slice %61 {offsets = [0, 256], sizes = [8, 128], strides = [1, 1]} : vector<8x384xf32> to vector<8x128xf32>
    %67 = arith.mulf %65, %35 : vector<8x128xf32>
    %68 = arith.mulf %64, %63 : vector<8x128xf32>
    %69 = arith.addf %67, %68 : vector<8x128xf32>
    %70 = math.tanh %69 : vector<8x128xf32>
    %71 = arith.mulf %66, %70 : vector<8x128xf32>
    %c8_i32_29 = arith.constant 8 : i32
    %72 = arith.muli %arg0, %c8_i32_29 : i32
    %73 = arith.addi %72, %c1_i32 : i32
    %74 = arith.sitofp %73 : i32 to f32
    %75 = vector.broadcast %74 : f32 to vector<8x1xf32>
    %76 = arith.cmpf olt, %75, %10 : vector<8x1xf32>
    %77 = arith.extui %76 : vector<8x1xi1> to vector<8x1xi32>
    %78 = arith.sitofp %77 : vector<8x1xi32> to vector<8x1xf32>
    %79 = vector.broadcast %78 : vector<8x1xf32> to vector<8x128xf32>
    %80 = arith.mulf %79, %71 : vector<8x128xf32>
    %81 = arith.addf %47, %80 : vector<8x128xf32>
    %c2_i32 = arith.constant 2 : i32
    %c8_i32_30 = arith.constant 8 : i32
    %82 = arith.muli %c2_i32, %c8_i32_30 : i32
    %83 = tpu.assume_multiple %82, 8 : i32
    %84 = arith.index_cast %83 : i32 to index
    %c0_31 = arith.constant 0 : index
    %85 = vector.load %arg9[%84, %c0_31] : memref<64x512xf32, #tpu.memory_space<vmem>>, vector<8x512xf32>
    %86 = arith.truncf %71 : vector<8x128xf32> to vector<8x128xbf16>
    %c0_32 = arith.constant 0 : index
    %c0_33 = arith.constant 0 : index
    %87 = vector.load %arg4[%c0_32, %c0_33] : memref<128x512xbf16, #tpu.memory_space<vmem>>, vector<128x512xbf16>
    %cst_34 = arith.constant dense<0.000000e+00> : vector<8x512xf32>
    %88 = tpu.matmul %86, %87, %cst_34 {dimension_numbers = #tpu.dot_dimension_numbers<[1], [0], [0], [1], [0, 0, 1, 1], [], []>} : vector<8x128xbf16>, vector<128x512xbf16>, vector<8x512xf32> -> vector<8x512xf32>
    %89 = arith.addf %85, %88 : vector<8x512xf32>
    %90 = vector.extract_strided_slice %89 {offsets = [0, 0], sizes = [8, 384], strides = [1, 1]} : vector<8x512xf32> to vector<8x384xf32>
    %91 = arith.negf %90 : vector<8x384xf32>
    %92 = math.exp %91 : vector<8x384xf32>
    %cst_35 = arith.constant 1.000000e+00 : f32
    %93 = vector.broadcast %cst_35 : f32 to vector<8x384xf32>
    %94 = arith.addf %93, %92 : vector<8x384xf32>
    %95 = arith.divf %93, %94 : vector<8x384xf32>
    %96 = vector.extract_strided_slice %89 {offsets = [0, 384], sizes = [8, 128], strides = [1, 1]} : vector<8x512xf32> to vector<8x128xf32>
    %97 = math.tanh %96 : vector<8x128xf32>
    %98 = vector.extract_strided_slice %95 {offsets = [0, 0], sizes = [8, 128], strides = [1, 1]} : vector<8x384xf32> to vector<8x128xf32>
    %99 = vector.extract_strided_slice %95 {offsets = [0, 128], sizes = [8, 128], strides = [1, 1]} : vector<8x384xf32> to vector<8x128xf32>
    %100 = vector.extract_strided_slice %95 {offsets = [0, 256], sizes = [8, 128], strides = [1, 1]} : vector<8x384xf32> to vector<8x128xf32>
    %101 = arith.mulf %99, %69 : vector<8x128xf32>
    %102 = arith.mulf %98, %97 : vector<8x128xf32>
    %103 = arith.addf %101, %102 : vector<8x128xf32>
    %104 = math.tanh %103 : vector<8x128xf32>
    %105 = arith.mulf %100, %104 : vector<8x128xf32>
    %c8_i32_36 = arith.constant 8 : i32
    %106 = arith.muli %arg0, %c8_i32_36 : i32
    %107 = arith.addi %106, %c2_i32 : i32
    %108 = arith.sitofp %107 : i32 to f32
    %109 = vector.broadcast %108 : f32 to vector<8x1xf32>
    %110 = arith.cmpf olt, %109, %10 : vector<8x1xf32>
    %111 = arith.extui %110 : vector<8x1xi1> to vector<8x1xi32>
    %112 = arith.sitofp %111 : vector<8x1xi32> to vector<8x1xf32>
    %113 = vector.broadcast %112 : vector<8x1xf32> to vector<8x128xf32>
    %114 = arith.mulf %113, %105 : vector<8x128xf32>
    %115 = arith.addf %81, %114 : vector<8x128xf32>
    %c3_i32 = arith.constant 3 : i32
    %c8_i32_37 = arith.constant 8 : i32
    %116 = arith.muli %c3_i32, %c8_i32_37 : i32
    %117 = tpu.assume_multiple %116, 8 : i32
    %118 = arith.index_cast %117 : i32 to index
    %c0_38 = arith.constant 0 : index
    %119 = vector.load %arg9[%118, %c0_38] : memref<64x512xf32, #tpu.memory_space<vmem>>, vector<8x512xf32>
    %120 = arith.truncf %105 : vector<8x128xf32> to vector<8x128xbf16>
    %c0_39 = arith.constant 0 : index
    %c0_40 = arith.constant 0 : index
    %121 = vector.load %arg4[%c0_39, %c0_40] : memref<128x512xbf16, #tpu.memory_space<vmem>>, vector<128x512xbf16>
    %cst_41 = arith.constant dense<0.000000e+00> : vector<8x512xf32>
    %122 = tpu.matmul %120, %121, %cst_41 {dimension_numbers = #tpu.dot_dimension_numbers<[1], [0], [0], [1], [0, 0, 1, 1], [], []>} : vector<8x128xbf16>, vector<128x512xbf16>, vector<8x512xf32> -> vector<8x512xf32>
    %123 = arith.addf %119, %122 : vector<8x512xf32>
    %124 = vector.extract_strided_slice %123 {offsets = [0, 0], sizes = [8, 384], strides = [1, 1]} : vector<8x512xf32> to vector<8x384xf32>
    %125 = arith.negf %124 : vector<8x384xf32>
    %126 = math.exp %125 : vector<8x384xf32>
    %cst_42 = arith.constant 1.000000e+00 : f32
    %127 = vector.broadcast %cst_42 : f32 to vector<8x384xf32>
    %128 = arith.addf %127, %126 : vector<8x384xf32>
    %129 = arith.divf %127, %128 : vector<8x384xf32>
    %130 = vector.extract_strided_slice %123 {offsets = [0, 384], sizes = [8, 128], strides = [1, 1]} : vector<8x512xf32> to vector<8x128xf32>
    %131 = math.tanh %130 : vector<8x128xf32>
    %132 = vector.extract_strided_slice %129 {offsets = [0, 0], sizes = [8, 128], strides = [1, 1]} : vector<8x384xf32> to vector<8x128xf32>
    %133 = vector.extract_strided_slice %129 {offsets = [0, 128], sizes = [8, 128], strides = [1, 1]} : vector<8x384xf32> to vector<8x128xf32>
    %134 = vector.extract_strided_slice %129 {offsets = [0, 256], sizes = [8, 128], strides = [1, 1]} : vector<8x384xf32> to vector<8x128xf32>
    %135 = arith.mulf %133, %103 : vector<8x128xf32>
    %136 = arith.mulf %132, %131 : vector<8x128xf32>
    %137 = arith.addf %135, %136 : vector<8x128xf32>
    %138 = math.tanh %137 : vector<8x128xf32>
    %139 = arith.mulf %134, %138 : vector<8x128xf32>
    %c8_i32_43 = arith.constant 8 : i32
    %140 = arith.muli %arg0, %c8_i32_43 : i32
    %141 = arith.addi %140, %c3_i32 : i32
    %142 = arith.sitofp %141 : i32 to f32
    %143 = vector.broadcast %142 : f32 to vector<8x1xf32>
    %144 = arith.cmpf olt, %143, %10 : vector<8x1xf32>
    %145 = arith.extui %144 : vector<8x1xi1> to vector<8x1xi32>
    %146 = arith.sitofp %145 : vector<8x1xi32> to vector<8x1xf32>
    %147 = vector.broadcast %146 : vector<8x1xf32> to vector<8x128xf32>
    %148 = arith.mulf %147, %139 : vector<8x128xf32>
    %149 = arith.addf %115, %148 : vector<8x128xf32>
    %c4_i32 = arith.constant 4 : i32
    %c8_i32_44 = arith.constant 8 : i32
    %150 = arith.muli %c4_i32, %c8_i32_44 : i32
    %151 = tpu.assume_multiple %150, 8 : i32
    %152 = arith.index_cast %151 : i32 to index
    %c0_45 = arith.constant 0 : index
    %153 = vector.load %arg9[%152, %c0_45] : memref<64x512xf32, #tpu.memory_space<vmem>>, vector<8x512xf32>
    %154 = arith.truncf %139 : vector<8x128xf32> to vector<8x128xbf16>
    %c0_46 = arith.constant 0 : index
    %c0_47 = arith.constant 0 : index
    %155 = vector.load %arg4[%c0_46, %c0_47] : memref<128x512xbf16, #tpu.memory_space<vmem>>, vector<128x512xbf16>
    %cst_48 = arith.constant dense<0.000000e+00> : vector<8x512xf32>
    %156 = tpu.matmul %154, %155, %cst_48 {dimension_numbers = #tpu.dot_dimension_numbers<[1], [0], [0], [1], [0, 0, 1, 1], [], []>} : vector<8x128xbf16>, vector<128x512xbf16>, vector<8x512xf32> -> vector<8x512xf32>
    %157 = arith.addf %153, %156 : vector<8x512xf32>
    %158 = vector.extract_strided_slice %157 {offsets = [0, 0], sizes = [8, 384], strides = [1, 1]} : vector<8x512xf32> to vector<8x384xf32>
    %159 = arith.negf %158 : vector<8x384xf32>
    %160 = math.exp %159 : vector<8x384xf32>
    %cst_49 = arith.constant 1.000000e+00 : f32
    %161 = vector.broadcast %cst_49 : f32 to vector<8x384xf32>
    %162 = arith.addf %161, %160 : vector<8x384xf32>
    %163 = arith.divf %161, %162 : vector<8x384xf32>
    %164 = vector.extract_strided_slice %157 {offsets = [0, 384], sizes = [8, 128], strides = [1, 1]} : vector<8x512xf32> to vector<8x128xf32>
    %165 = math.tanh %164 : vector<8x128xf32>
    %166 = vector.extract_strided_slice %163 {offsets = [0, 0], sizes = [8, 128], strides = [1, 1]} : vector<8x384xf32> to vector<8x128xf32>
    %167 = vector.extract_strided_slice %163 {offsets = [0, 128], sizes = [8, 128], strides = [1, 1]} : vector<8x384xf32> to vector<8x128xf32>
    %168 = vector.extract_strided_slice %163 {offsets = [0, 256], sizes = [8, 128], strides = [1, 1]} : vector<8x384xf32> to vector<8x128xf32>
    %169 = arith.mulf %167, %137 : vector<8x128xf32>
    %170 = arith.mulf %166, %165 : vector<8x128xf32>
    %171 = arith.addf %169, %170 : vector<8x128xf32>
    %172 = math.tanh %171 : vector<8x128xf32>
    %173 = arith.mulf %168, %172 : vector<8x128xf32>
    %c8_i32_50 = arith.constant 8 : i32
    %174 = arith.muli %arg0, %c8_i32_50 : i32
    %175 = arith.addi %174, %c4_i32 : i32
    %176 = arith.sitofp %175 : i32 to f32
    %177 = vector.broadcast %176 : f32 to vector<8x1xf32>
    %178 = arith.cmpf olt, %177, %10 : vector<8x1xf32>
    %179 = arith.extui %178 : vector<8x1xi1> to vector<8x1xi32>
    %180 = arith.sitofp %179 : vector<8x1xi32> to vector<8x1xf32>
    %181 = vector.broadcast %180 : vector<8x1xf32> to vector<8x128xf32>
    %182 = arith.mulf %181, %173 : vector<8x128xf32>
    %183 = arith.addf %149, %182 : vector<8x128xf32>
    %c5_i32 = arith.constant 5 : i32
    %c8_i32_51 = arith.constant 8 : i32
    %184 = arith.muli %c5_i32, %c8_i32_51 : i32
    %185 = tpu.assume_multiple %184, 8 : i32
    %186 = arith.index_cast %185 : i32 to index
    %c0_52 = arith.constant 0 : index
    %187 = vector.load %arg9[%186, %c0_52] : memref<64x512xf32, #tpu.memory_space<vmem>>, vector<8x512xf32>
    %188 = arith.truncf %173 : vector<8x128xf32> to vector<8x128xbf16>
    %c0_53 = arith.constant 0 : index
    %c0_54 = arith.constant 0 : index
    %189 = vector.load %arg4[%c0_53, %c0_54] : memref<128x512xbf16, #tpu.memory_space<vmem>>, vector<128x512xbf16>
    %cst_55 = arith.constant dense<0.000000e+00> : vector<8x512xf32>
    %190 = tpu.matmul %188, %189, %cst_55 {dimension_numbers = #tpu.dot_dimension_numbers<[1], [0], [0], [1], [0, 0, 1, 1], [], []>} : vector<8x128xbf16>, vector<128x512xbf16>, vector<8x512xf32> -> vector<8x512xf32>
    %191 = arith.addf %187, %190 : vector<8x512xf32>
    %192 = vector.extract_strided_slice %191 {offsets = [0, 0], sizes = [8, 384], strides = [1, 1]} : vector<8x512xf32> to vector<8x384xf32>
    %193 = arith.negf %192 : vector<8x384xf32>
    %194 = math.exp %193 : vector<8x384xf32>
    %cst_56 = arith.constant 1.000000e+00 : f32
    %195 = vector.broadcast %cst_56 : f32 to vector<8x384xf32>
    %196 = arith.addf %195, %194 : vector<8x384xf32>
    %197 = arith.divf %195, %196 : vector<8x384xf32>
    %198 = vector.extract_strided_slice %191 {offsets = [0, 384], sizes = [8, 128], strides = [1, 1]} : vector<8x512xf32> to vector<8x128xf32>
    %199 = math.tanh %198 : vector<8x128xf32>
    %200 = vector.extract_strided_slice %197 {offsets = [0, 0], sizes = [8, 128], strides = [1, 1]} : vector<8x384xf32> to vector<8x128xf32>
    %201 = vector.extract_strided_slice %197 {offsets = [0, 128], sizes = [8, 128], strides = [1, 1]} : vector<8x384xf32> to vector<8x128xf32>
    %202 = vector.extract_strided_slice %197 {offsets = [0, 256], sizes = [8, 128], strides = [1, 1]} : vector<8x384xf32> to vector<8x128xf32>
    %203 = arith.mulf %201, %171 : vector<8x128xf32>
    %204 = arith.mulf %200, %199 : vector<8x128xf32>
    %205 = arith.addf %203, %204 : vector<8x128xf32>
    %206 = math.tanh %205 : vector<8x128xf32>
    %207 = arith.mulf %202, %206 : vector<8x128xf32>
    %c8_i32_57 = arith.constant 8 : i32
    %208 = arith.muli %arg0, %c8_i32_57 : i32
    %209 = arith.addi %208, %c5_i32 : i32
    %210 = arith.sitofp %209 : i32 to f32
    %211 = vector.broadcast %210 : f32 to vector<8x1xf32>
    %212 = arith.cmpf olt, %211, %10 : vector<8x1xf32>
    %213 = arith.extui %212 : vector<8x1xi1> to vector<8x1xi32>
    %214 = arith.sitofp %213 : vector<8x1xi32> to vector<8x1xf32>
    %215 = vector.broadcast %214 : vector<8x1xf32> to vector<8x128xf32>
    %216 = arith.mulf %215, %207 : vector<8x128xf32>
    %217 = arith.addf %183, %216 : vector<8x128xf32>
    %c6_i32 = arith.constant 6 : i32
    %c8_i32_58 = arith.constant 8 : i32
    %218 = arith.muli %c6_i32, %c8_i32_58 : i32
    %219 = tpu.assume_multiple %218, 8 : i32
    %220 = arith.index_cast %219 : i32 to index
    %c0_59 = arith.constant 0 : index
    %221 = vector.load %arg9[%220, %c0_59] : memref<64x512xf32, #tpu.memory_space<vmem>>, vector<8x512xf32>
    %222 = arith.truncf %207 : vector<8x128xf32> to vector<8x128xbf16>
    %c0_60 = arith.constant 0 : index
    %c0_61 = arith.constant 0 : index
    %223 = vector.load %arg4[%c0_60, %c0_61] : memref<128x512xbf16, #tpu.memory_space<vmem>>, vector<128x512xbf16>
    %cst_62 = arith.constant dense<0.000000e+00> : vector<8x512xf32>
    %224 = tpu.matmul %222, %223, %cst_62 {dimension_numbers = #tpu.dot_dimension_numbers<[1], [0], [0], [1], [0, 0, 1, 1], [], []>} : vector<8x128xbf16>, vector<128x512xbf16>, vector<8x512xf32> -> vector<8x512xf32>
    %225 = arith.addf %221, %224 : vector<8x512xf32>
    %226 = vector.extract_strided_slice %225 {offsets = [0, 0], sizes = [8, 384], strides = [1, 1]} : vector<8x512xf32> to vector<8x384xf32>
    %227 = arith.negf %226 : vector<8x384xf32>
    %228 = math.exp %227 : vector<8x384xf32>
    %cst_63 = arith.constant 1.000000e+00 : f32
    %229 = vector.broadcast %cst_63 : f32 to vector<8x384xf32>
    %230 = arith.addf %229, %228 : vector<8x384xf32>
    %231 = arith.divf %229, %230 : vector<8x384xf32>
    %232 = vector.extract_strided_slice %225 {offsets = [0, 384], sizes = [8, 128], strides = [1, 1]} : vector<8x512xf32> to vector<8x128xf32>
    %233 = math.tanh %232 : vector<8x128xf32>
    %234 = vector.extract_strided_slice %231 {offsets = [0, 0], sizes = [8, 128], strides = [1, 1]} : vector<8x384xf32> to vector<8x128xf32>
    %235 = vector.extract_strided_slice %231 {offsets = [0, 128], sizes = [8, 128], strides = [1, 1]} : vector<8x384xf32> to vector<8x128xf32>
    %236 = vector.extract_strided_slice %231 {offsets = [0, 256], sizes = [8, 128], strides = [1, 1]} : vector<8x384xf32> to vector<8x128xf32>
    %237 = arith.mulf %235, %205 : vector<8x128xf32>
    %238 = arith.mulf %234, %233 : vector<8x128xf32>
    %239 = arith.addf %237, %238 : vector<8x128xf32>
    %240 = math.tanh %239 : vector<8x128xf32>
    %241 = arith.mulf %236, %240 : vector<8x128xf32>
    %c8_i32_64 = arith.constant 8 : i32
    %242 = arith.muli %arg0, %c8_i32_64 : i32
    %243 = arith.addi %242, %c6_i32 : i32
    %244 = arith.sitofp %243 : i32 to f32
    %245 = vector.broadcast %244 : f32 to vector<8x1xf32>
    %246 = arith.cmpf olt, %245, %10 : vector<8x1xf32>
    %247 = arith.extui %246 : vector<8x1xi1> to vector<8x1xi32>
    %248 = arith.sitofp %247 : vector<8x1xi32> to vector<8x1xf32>
    %249 = vector.broadcast %248 : vector<8x1xf32> to vector<8x128xf32>
    %250 = arith.mulf %249, %241 : vector<8x128xf32>
    %251 = arith.addf %217, %250 : vector<8x128xf32>
    %c7_i32 = arith.constant 7 : i32
    %c8_i32_65 = arith.constant 8 : i32
    %252 = arith.muli %c7_i32, %c8_i32_65 : i32
    %253 = tpu.assume_multiple %252, 8 : i32
    %254 = arith.index_cast %253 : i32 to index
    %c0_66 = arith.constant 0 : index
    %255 = vector.load %arg9[%254, %c0_66] : memref<64x512xf32, #tpu.memory_space<vmem>>, vector<8x512xf32>
    %256 = arith.truncf %241 : vector<8x128xf32> to vector<8x128xbf16>
    %c0_67 = arith.constant 0 : index
    %c0_68 = arith.constant 0 : index
    %257 = vector.load %arg4[%c0_67, %c0_68] : memref<128x512xbf16, #tpu.memory_space<vmem>>, vector<128x512xbf16>
    %cst_69 = arith.constant dense<0.000000e+00> : vector<8x512xf32>
    %258 = tpu.matmul %256, %257, %cst_69 {dimension_numbers = #tpu.dot_dimension_numbers<[1], [0], [0], [1], [0, 0, 1, 1], [], []>} : vector<8x128xbf16>, vector<128x512xbf16>, vector<8x512xf32> -> vector<8x512xf32>
    %259 = arith.addf %255, %258 : vector<8x512xf32>
    %260 = vector.extract_strided_slice %259 {offsets = [0, 0], sizes = [8, 384], strides = [1, 1]} : vector<8x512xf32> to vector<8x384xf32>
    %261 = arith.negf %260 : vector<8x384xf32>
    %262 = math.exp %261 : vector<8x384xf32>
    %cst_70 = arith.constant 1.000000e+00 : f32
    %263 = vector.broadcast %cst_70 : f32 to vector<8x384xf32>
    %264 = arith.addf %263, %262 : vector<8x384xf32>
    %265 = arith.divf %263, %264 : vector<8x384xf32>
    %266 = vector.extract_strided_slice %259 {offsets = [0, 384], sizes = [8, 128], strides = [1, 1]} : vector<8x512xf32> to vector<8x128xf32>
    %267 = math.tanh %266 : vector<8x128xf32>
    %268 = vector.extract_strided_slice %265 {offsets = [0, 0], sizes = [8, 128], strides = [1, 1]} : vector<8x384xf32> to vector<8x128xf32>
    %269 = vector.extract_strided_slice %265 {offsets = [0, 128], sizes = [8, 128], strides = [1, 1]} : vector<8x384xf32> to vector<8x128xf32>
    %270 = vector.extract_strided_slice %265 {offsets = [0, 256], sizes = [8, 128], strides = [1, 1]} : vector<8x384xf32> to vector<8x128xf32>
    %271 = arith.mulf %269, %239 : vector<8x128xf32>
    %272 = arith.mulf %268, %267 : vector<8x128xf32>
    %273 = arith.addf %271, %272 : vector<8x128xf32>
    %274 = math.tanh %273 : vector<8x128xf32>
    %275 = arith.mulf %270, %274 : vector<8x128xf32>
    %c8_i32_71 = arith.constant 8 : i32
    %276 = arith.muli %arg0, %c8_i32_71 : i32
    %277 = arith.addi %276, %c7_i32 : i32
    %278 = arith.sitofp %277 : i32 to f32
    %279 = vector.broadcast %278 : f32 to vector<8x1xf32>
    %280 = arith.cmpf olt, %279, %10 : vector<8x1xf32>
    %281 = arith.extui %280 : vector<8x1xi1> to vector<8x1xi32>
    %282 = arith.sitofp %281 : vector<8x1xi32> to vector<8x1xf32>
    %283 = vector.broadcast %282 : vector<8x1xf32> to vector<8x128xf32>
    %284 = arith.mulf %283, %275 : vector<8x128xf32>
    %285 = arith.addf %251, %284 : vector<8x128xf32>
    %c8_i32_72 = arith.constant 8 : i32
    %c0_73 = arith.constant 0 : index
    %c0_74 = arith.constant 0 : index
    %286 = vector.load %arg10[%c0_73, %c0_74] : memref<8x128xf32, #tpu.memory_space<vmem>>, vector<8x128xf32>
    tpu.vector_store %arg10[%c0_73, %c0_74], %275 {strides = array<i32>} : memref<8x128xf32, #tpu.memory_space<vmem>>, vector<8x128xf32>,
    %c0_75 = arith.constant 0 : index
    %c0_76 = arith.constant 0 : index
    %287 = vector.load %arg11[%c0_75, %c0_76] : memref<8x128xf32, #tpu.memory_space<vmem>>, vector<8x128xf32>
    tpu.vector_store %arg11[%c0_75, %c0_76], %273 {strides = array<i32>} : memref<8x128xf32, #tpu.memory_space<vmem>>, vector<8x128xf32>,
    %c0_77 = arith.constant 0 : index
    %c0_78 = arith.constant 0 : index
    %288 = vector.load %arg12[%c0_77, %c0_78] : memref<8x128xf32, #tpu.memory_space<vmem>>, vector<8x128xf32>
    tpu.vector_store %arg12[%c0_77, %c0_78], %285 {strides = array<i32>} : memref<8x128xf32, #tpu.memory_space<vmem>>, vector<8x128xf32>,
    %c0_i32_79 = arith.constant 0 : i32
    %289 = arith.cmpi eq, %arg0, %c0_i32_79 : i32
    %290 = arith.extui %289 : i1 to i32
    %c0_i32_80 = arith.constant 0 : i32
    %291 = arith.cmpi ne, %290, %c0_i32_80 : i32
    scf.if %291 {
      %c0_81 = arith.constant 0 : index
      %c0_82 = arith.constant 0 : index
      %292 = vector.load %arg12[%c0_81, %c0_82] : memref<8x128xf32, #tpu.memory_space<vmem>>, vector<8x128xf32>
      %293 = tpu.reciprocal %10 : vector<8x1xf32> -> vector<8x1xf32>
      %294 = vector.broadcast %293 : vector<8x1xf32> to vector<8x128xf32>
      %295 = arith.mulf %292, %294 : vector<8x128xf32>
      %296 = arith.truncf %295 : vector<8x128xf32> to vector<8x128xbf16>
      %c0_83 = arith.constant 0 : index
      %c0_84 = arith.constant 0 : index
      %297 = vector.load %arg6[%c0_83, %c0_84] : memref<128x128xbf16, #tpu.memory_space<vmem>>, vector<128x128xbf16>
      %cst_85 = arith.constant dense<0.000000e+00> : vector<8x128xf32>
      %298 = tpu.matmul %296, %297, %cst_85 {dimension_numbers = #tpu.dot_dimension_numbers<[1], [0], [0], [1], [0, 0, 1, 1], [], []>} : vector<8x128xbf16>, vector<128x128xbf16>, vector<8x128xf32> -> vector<8x128xf32>
      %c0_86 = arith.constant 0 : index
      %c0_87 = arith.constant 0 : index
      %299 = vector.load %arg7[%c0_86, %c0_87] : memref<1x128xf32, #tpu.memory_space<vmem>>, vector<1x128xf32>
      %300 = vector.broadcast %299 : vector<1x128xf32> to vector<8x128xf32>
      %301 = arith.addf %298, %300 : vector<8x128xf32>
      %302 = arith.negf %301 : vector<8x128xf32>
      %303 = math.exp %302 : vector<8x128xf32>
      %cst_88 = arith.constant 1.000000e+00 : f32
      %304 = vector.broadcast %cst_88 : f32 to vector<8x128xf32>
      %305 = arith.addf %304, %303 : vector<8x128xf32>
      %306 = arith.divf %304, %305 : vector<8x128xf32>
      %c0_89 = arith.constant 0 : index
      %c0_90 = arith.constant 0 : index
      %307 = vector.load %arg8[%c0_89, %c0_90] : memref<8x128xf32, #tpu.memory_space<vmem>>, vector<8x128xf32>
      tpu.vector_store %arg8[%c0_89, %c0_90], %306 {strides = array<i32>} : memref<8x128xf32, #tpu.memory_space<vmem>>, vector<8x128xf32>,
    } else {
    }
    return
  }
  func.func @transform_0(%arg0: i32) -> (i32, i32) {
    %c0_i32 = arith.constant 0 : i32
    %c0_i32_0 = arith.constant 0 : i32
    return %arg0, %c0_i32 : i32, i32
  }
  func.func @transform_1(%arg0: i32) -> (i32, i32) {
    %c0_i32 = arith.constant 0 : i32
    %c0_i32_0 = arith.constant 0 : i32
    %c0_i32_1 = arith.constant 0 : i32
    return %c0_i32, %c0_i32_0 : i32, i32
  }
  func.func @transform_2(%arg0: i32) -> (i32, i32) {
    %c0_i32 = arith.constant 0 : i32
    %c0_i32_0 = arith.constant 0 : i32
    %c0_i32_1 = arith.constant 0 : i32
    return %c0_i32, %c0_i32_0 : i32, i32
  }
  func.func @transform_3(%arg0: i32) -> (i32, i32) {
    %c0_i32 = arith.constant 0 : i32
    %c0_i32_0 = arith.constant 0 : i32
    %c0_i32_1 = arith.constant 0 : i32
    return %c0_i32, %c0_i32_0 : i32, i32
  }
  func.func @transform_4(%arg0: i32) -> (i32, i32) {
    %c0_i32 = arith.constant 0 : i32
    %c0_i32_0 = arith.constant 0 : i32
    %c0_i32_1 = arith.constant 0 : i32
    return %c0_i32, %c0_i32_0 : i32, i32
  }
  func.func @transform_5(%arg0: i32) -> (i32, i32) {
    %c0_i32 = arith.constant 0 : i32
    %c0_i32_0 = arith.constant 0 : i32
    %c0_i32_1 = arith.constant 0 : i32
    return %c0_i32, %c0_i32_0 : i32, i32
  }
  func.func @transform_6(%arg0: i32) -> (i32, i32) {
    %c0_i32 = arith.constant 0 : i32
    %c0_i32_0 = arith.constant 0 : i32
    %c0_i32_1 = arith.constant 0 : i32
    return %c0_i32, %c0_i32_0 : i32, i32
  }
  func.func @transform_7(%arg0: i32) -> (i32, i32) {
    %c0_i32 = arith.constant 0 : i32
    %c0_i32_0 = arith.constant 0 : i32
    %c0_i32_1 = arith.constant 0 : i32
    return %c0_i32, %c0_i32_0 : i32, i32
  }
}

</mosaic_0001>

<bundles_post_ra>
// kernel: tpu_custom_call.1
= control target key start
LH: loop header
LB: loop body
LE: loop exit
PB: predicated region body
PF: predicated region fallthrough
CT: control target
= control target key end

     0   :  { %12 = vsyncpa [#allocation7], 0  ;;  %s2956_s0 = inlined_call_operand.vmem [shape: bf16[64,32], index: 0, kind: input, shape index: {}]   ;;  %s2957_s1 = inlined_call_operand.vmem [shape: f32[8,1], index: 1, kind: input, shape index: {}]   ;;  %s2958_s2 = inlined_call_operand.vmem [shape: bf16[32,512], index: 2, kind: input, shape index: {}]   ;;  %s2959_s3 = inlined_call_operand.hbm [shape: bf16[128,512], index: 3, kind: input, shape index: {}]   ;;  %s2960_s4 = inlined_call_operand.vmem [shape: f32[1,512], index: 4, kind: input, shape index: {}]   ;;  %s2961_s5 = inlined_call_operand.hbm [shape: bf16[128,128], index: 5, kind: input, shape index: {}]   ;;  %s2962_s6 = inlined_call_operand.vmem [shape: f32[1,128], index: 6, kind: input, shape index: {}]   ;;  %s2963_s7 = inlined_call_operand.hbm [shape: f32[8,128], index: 7, kind: output, shape index: {}]  }
   0x1   :  { %13 = vsyncpa [#allocation10], 0 }
   0x2   :  { %14 = vsyncpa [#allocation8], 0  ;;  %s2212_s24 = smov [#allocation6]   ;;  %s2140_s28 = scalar_lea.hbm %s2959_s3, 4096 }
   0x3   :  { %s26_s25 = sshll.u32 %s2212_s24, 4  ;;  %p2141_p0 = scmp.ne.s32.totalorder %s2959_s3, %s2140_s28  ;;  %s27_s25 = int_to_ptr.vmem [resolvable:$true] %s26_s25 }
   0x4   :  { %p2144_p1 = scmp.lt.u32.totalorder %s2140_s28, %s2959_s3 }
   0x6   :  { %p2146_p2 = pnand %p2144_p1, %p2141_p0 }
   0x8   :  { %2149 = shalt.err (!%p2146_p2)
}
   0x9   :  { %s2150_s10 = scalar_lea.vmem %s27_s25, 4096  ;;  %p2155_p4 = scmp.lt.s32.totalorder %s27_s25, %s27_s25 }
   0xa   :  { %p2151_p3 = scmp.ne.s32.totalorder %s27_s25, %s2150_s10  ;;  %p2156_p5 = scmp.lt.s32.totalorder %s2150_s10, %s2150_s10 }
   0xc   :  { %p2157_p6 = por %p2156_p5, %p2155_p4 }
   0xe   :  { %p2158_p7 = pnand %p2157_p6, %p2151_p3 }
  0x10   :  { %2161 = shalt.err (!%p2158_p7)
}
  0x11   :  { %s2213_s11 = smov 256   ;;  %s2214_s12 = smov 16  }
  0x12   :  { %32 = dma.hbm_to_vmem [thread:$0]  %s2959_s3, 4096, %s27_s25, [#allocation7], %s2213_s11, %s2213_s11, %s2214_s12  }
  0x13   :  { %s2215_s15 = smov [#allocation9]   ;;  %s2162_s19 = scalar_lea.hbm %s2961_s5, 1024 }
  0x14   :  { %s40_s16 = sshll.u32 %s2215_s15, 4  ;;  %p2163_p8 = scmp.ne.s32.totalorder %s2961_s5, %s2162_s19  ;;  %s41_s16 = int_to_ptr.vmem [resolvable:$true] %s40_s16 }
  0x15   :  { %p2166_p9 = scmp.lt.u32.totalorder %s2162_s19, %s2961_s5 }
  0x17   :  { %p2168_p10 = pnand %p2166_p9, %p2163_p8 }
  0x19   :  { %2171 = shalt.err (!%p2168_p10)
}
  0x1a   :  { %s2172_s24 = scalar_lea.vmem %s41_s16, 1024  ;;  %p2177_p12 = scmp.lt.s32.totalorder %s41_s16, %s41_s16 }
  0x1b   :  { %p2173_p11 = scmp.ne.s32.totalorder %s41_s16, %s2172_s24  ;;  %p2178_p13 = scmp.lt.s32.totalorder %s2172_s24, %s2172_s24 }
  0x1d   :  { %p2179_p0 = por %p2178_p13, %p2177_p12 }
  0x1f   :  { %p2180_p1 = pnand %p2179_p0, %p2173_p11 }
  0x21   :  { %2183 = shalt.err (!%p2180_p1)
}
  0x22   :  { %s2216_s3 = smov 64   ;;  %s2217_s25 = smov 4  }
  0x23   :  { %46 = dma.hbm_to_vmem [thread:$0]  %s2961_s5, 1024, %s41_s16, [#allocation10], %s2216_s3, %s2216_s3, %s2217_s25  }
  0x24   :  { %2206 = dma.done.wait [#allocation7], 4096  }
  0x25   :  { %2207 = vsyncadd [#allocation7], 4294963200 }
  0x26   :  { %2208 = dma.done.wait [#allocation10], 1024  }
  0x27   :  { %2209 = vsyncadd [#allocation10], 4294966272  ;;  %v2966_v0 = vmov 0   ;;  %v1901_v1 = vld [vmem:[%s2958_s2 + $0x4] ss:$16 sps:$4 sm:$0xff]   ;;  %vm161_vm0 = vcmask 261120   ;;  %v81_v51 = vlaneseq }
  0x28   :  { %206 = vmatprep.mubr.bf16.mxu0 %v2966_v0  ;;  %279 = vmatprep.mubr.bf16.mxu1 %v2966_v0  ;;  %v1903_v2 = vld [vmem:[%s2958_s2 + $0xc] ss:$16 sps:$4 sm:$0xff]   ;;  %v1905_v3 = vld [vmem:[%s2958_s2] ss:$16 sps:$4 sm:$0xff]   ;;  %v1906_v4 = vld [vmem:[%s2958_s2 + $0x8] ss:$16 sps:$4 sm:$0xff]  }
  0x29   :  { %1894 = vset.pattern.permute.xlu0 %v2966_v0  ;;  %1900 = vset.pattern.permute.xlu1 %v2966_v0  ;;  %v1907_v5 = vld [vmem:[%s2958_s2 + $0x24] ss:$16 sps:$4 sm:$0xff]   ;;  %v1909_v6 = vld [vmem:[%s2958_s2 + $0x2c] ss:$16 sps:$4 sm:$0xff]   ;;  %v1911_v7 = vld [vmem:[%s2958_s2 + $0x20] ss:$16 sps:$4 sm:$0xff]  }
  0x2a   :  { %174 = vmatprep.subr.bf16.mxu0 %v1901_v1  ;;  %247 = vmatprep.subr.bf16.mxu1 %v1903_v2  ;;  %v1912_v8 = vld [vmem:[%s2958_s2 + $0x28] ss:$16 sps:$4 sm:$0xff]   ;;  %v1913_v9 = vld [vmem:[%s2956_s0] sm:$0xff]   ;;  %v2320_v11 = vld [vmem:[#allocation6 + $0xc] ss:$16 sps:$4 sm:$0xff]   ;;  %v2964_v44 = vmov 0.0  }
  0x2b   :  { %175 = vmatpush1.bf16.msra.mxu0 %v1905_v3  ;;  %248 = vmatpush1.bf16.msra.mxu1 %v1906_v4  ;;  %v2318_v10 = vld [vmem:[#allocation6 + $0x4] ss:$16 sps:$4 sm:$0xff]   ;;  %v2322_v12 = vld [vmem:[#allocation6] ss:$16 sps:$4 sm:$0xff]   ;;  %v2324_v13 = vld [vmem:[#allocation6 + $0x8] ss:$16 sps:$4 sm:$0xff]  }
  0x2c   :  { %176 = vmatprep.subr.bf16.mxu0 %v1907_v5  ;;  %249 = vmatprep.subr.bf16.mxu1 %v1909_v6  ;;  %v2327_v14 = vld [vmem:[#allocation6 + $0x24] ss:$16 sps:$4 sm:$0xff]   ;;  %v2330_v15 = vld [vmem:[#allocation6 + $0x2c] ss:$16 sps:$4 sm:$0xff]   ;;  %v2334_v16 = vld [vmem:[#allocation6 + $0x20] ss:$16 sps:$4 sm:$0xff]  }
  0x2d   :  { %v2338_v17 = vld [vmem:[#allocation6 + $0x28] ss:$16 sps:$4 sm:$0xff]   ;;  %v2342_v18 = vld [vmem:[#allocation6 + $0x44] ss:$16 sps:$4 sm:$0xff]   ;;  %v2349_v20 = vld [vmem:[#allocation6 + $0x4c] ss:$16 sps:$4 sm:$0xff]  }
  0x2e   :  { %v1926_v19 = vld [vmem:[%s2956_s0 + $0x8] sm:$0xff]   ;;  %v2351_v21 = vld [vmem:[#allocation6 + $0x40] ss:$16 sps:$4 sm:$0xff]   ;;  %v2359_v23 = vld [vmem:[#allocation6 + $0x64] ss:$16 sps:$4 sm:$0xff]   ;;  %v2220_v50 = vmov 0.0|0.0  }
  0x2f   :  { %177 = vmatpush1.bf16.msra.mxu0 %v1911_v7  ;;  %250 = vmatpush1.bf16.msra.mxu1 %v1912_v8  ;;  %v2355_v22 = vld [vmem:[#allocation6 + $0x48] ss:$16 sps:$4 sm:$0xff]   ;;  %v2361_v24 = vld [vmem:[#allocation6 + $0x6c] ss:$16 sps:$4 sm:$0xff]   ;;  %v2365_v25 = vld [vmem:[#allocation6 + $0x60] ss:$16 sps:$4 sm:$0xff]  }
  0x30   :  { %556 = vmatprep.subr.bf16.mxu0 %v2318_v10  ;;  %597 = vmatprep.subr.bf16.mxu1 %v2320_v11  ;;  %v2369_v26 = vld [vmem:[#allocation6 + $0x68] ss:$16 sps:$4 sm:$0xff]   ;;  %v2373_v27 = vld [vmem:[#allocation6 + $0x84] ss:$16 sps:$4 sm:$0xff]   ;;  %v2375_v28 = vld [vmem:[#allocation6 + $0x8c] ss:$16 sps:$4 sm:$0xff]  }
  0x31   :  { %v1939_v29 = vld [vmem:[%s2956_s0 + $0x10] sm:$0xff]   ;;  %v2384_v31 = vld [vmem:[#allocation6 + $0x88] ss:$16 sps:$4 sm:$0xff]   ;;  %v2392_v33 = vld [vmem:[#allocation6 + $0xac] ss:$16 sps:$4 sm:$0xff]   ;;  %v82_v52 = vshrl.u32 %v81_v51, 7 }
  0x32   :  { %1764 = vmatmul.mubr.msk.bf16.vlgmr.msra.gmra.mrb[0].mxu0 %vm161_vm0, %v1913_v9  ;;  %1768 = vmatmul.mubr.msk.bf16.vlgmr.msra.gmra.mrb[0].mxu1 %vm161_vm0, %v1913_v9  ;;  %v2382_v30 = vld [vmem:[#allocation6 + $0x80] ss:$16 sps:$4 sm:$0xff]   ;;  %v2388_v32 = vld [vmem:[#allocation6 + $0xa4] ss:$16 sps:$4 sm:$0xff]   ;;  %v2398_v35 = vld [vmem:[#allocation6 + $0xa8] ss:$16 sps:$4 sm:$0xff]  }
  0x33   :  { %557 = vmatpush1.bf16.msra.mxu0 %v2322_v12  ;;  %598 = vmatpush1.bf16.msra.mxu1 %v2324_v13  ;;  %v2396_v34 = vld [vmem:[#allocation6 + $0xa0] ss:$16 sps:$4 sm:$0xff]   ;;  %v2402_v36 = vld [vmem:[#allocation6 + $0xc4] ss:$16 sps:$4 sm:$0xff]   ;;  %v1952_v37 = vld [vmem:[%s2956_s0 + $0x18] sm:$0xff]   ;;  %v91_v53 = vsub.s32 2, %v82_v52 }
  0x34   :  { %558 = vmatprep.subr.bf16.mxu0 %v2327_v14  ;;  %599 = vmatprep.subr.bf16.mxu1 %v2330_v15  ;;  %v2409_v38 = vld [vmem:[#allocation6 + $0xcc] ss:$16 sps:$4 sm:$0xff]   ;;  %v2413_v39 = vld [vmem:[#allocation6 + $0xc0] ss:$16 sps:$4 sm:$0xff]   ;;  %v2415_v40 = vld [vmem:[#allocation6 + $0xc8] ss:$16 sps:$4 sm:$0xff]  }
  0x35   :  { %216 = vmatprep.mubr.bf16.mxu0 %v2966_v0  ;;  %289 = vmatprep.mubr.bf16.mxu1 %v2966_v0  ;;  %v2420_v41 = vld [vmem:[%s2957_s1] sm:$0xff]  ;;  %v2424_v43 = vld [vmem:[#allocation6 + $0xec] ss:$16 sps:$4 sm:$0xff]   ;;  %v2436_v48 = vld [vmem:[#allocation6 + $0xe8] ss:$16 sps:$4 sm:$0xff]   ;;  %v95_v54 = vsub.s32 3, %v82_v52 }
  0x36   :  { %v2422_v42 = vld [vmem:[#allocation6 + $0xe4] ss:$16 sps:$4 sm:$0xff]   ;;  %vm1807_vm1 = vcmp.gt.f32.partialorder %v2420_v41, 0.0  ;;  %vm1812_vm2 = vcmp.gt.f32.partialorder %v2420_v41, 1.0  ;;  %v2434_v47 = vld [vmem:[#allocation6 + $0xe0] ss:$16 sps:$4 sm:$0xff]  }
  0x37   :  { %559 = vmatpush1.bf16.msra.mxu0 %v2334_v16  ;;  %600 = vmatpush1.bf16.msra.mxu1 %v2338_v17  ;;  %v1808_v45 = vsel %vm1807_vm1, 1.0, %v2964_v44  ;;  %v1813_v46 = vsel %vm1812_vm2, 1.0, %v2964_v44  ;;  %v83_v55 = vsub.s32 0, %v82_v52  ;;  %v79_v56 = vld [vmem:[%s2960_s4] sm:$0xf]  ;;  %v87_v57 = vsub.s32 1, %v82_v52 }
  0x38   :  { %560 = vmatprep.subr.bf16.mxu0 %v2342_v18  ;;  %601 = vmatprep.subr.bf16.mxu1 %v2349_v20  ;;  %v1895_v49 = vpack.i.bf16 %v1813_v46, %v1808_v45  ;;  %v2487_v58 = vrot.slane %v79_v56, %v91_v53  ;;  %v2493_v61 = vrot.slane %v79_v56, %v95_v54  ;;  %vm1817_vm3 = vcmp.gt.f32.partialorder %v2420_v41, 2.0  ;;  %s2222_s8 = smov [#allocation11]  }
  0x39   :  { %v84_v62 = vrot.slane %v79_v56, %v83_v55  ;;  %v88_v2 = vrot.slane %v79_v56, %v87_v57  ;;  %vm1822_vm4 = vcmp.gt.f32.partialorder %v2420_v41, 3.0  ;;  %vm1827_vm5 = vcmp.gt.f32.partialorder %v2420_v41, 4.0  ;;  %s1735_s5 = sshll.u32 %s2222_s8, 4  ;;  %s1736_s5 = int_to_ptr.vmem [resolvable:$true] %s1735_s5 }
  0x3a   :  { %1765 = vmatmul.mubr.msk.bf16.gmra.mrb[4].mxu0 %vm161_vm0, %v1926_v19  ;;  %1769 = vmatmul.mubr.msk.bf16.gmra.mrb[4].mxu1 %vm161_vm0, %v1926_v19  ;;  %vm1832_vm6 = vcmp.gt.f32.partialorder %v2420_v41, 5.0  ;;  %vm2221_vm9 = vmmov 0   ;;  %s2184_s9 = scalar_lea.vmem %s1736_s5, 128  ;;  %p2189_p3 = scmp.lt.s32.totalorder %s1736_s5, %s1736_s5 }
  0x3b   :  { %561 = vmatpush1.bf16.msra.mxu0 %v2351_v21  ;;  %602 = vmatpush1.bf16.msra.mxu1 %v2355_v22  ;;  %p2185_p2 = scmp.ne.s32.totalorder %s1736_s5, %s2184_s9  ;;  %p2190_p4 = scmp.lt.s32.totalorder %s2184_s9, %s2184_s9 }
  0x3c   :  { %562 = vmatprep.subr.bf16.mxu0 %v2359_v23  ;;  %603 = vmatprep.subr.bf16.mxu1 %v2361_v24 }
  0x3d   :  { %226 = vmatprep.mubr.bf16.mxu0 %v2966_v0  ;;  %299 = vmatprep.mubr.bf16.mxu1 %v2966_v0  ;;  %p2191_p5 = por %p2190_p4, %p2189_p3 }
  0x3e   :  { %1896 = vperm.xlu0 %1894, %v1895_v49  }
  0x3f   :  { %563 = vmatpush1.bf16.msra.mxu0 %v2365_v25  ;;  %604 = vmatpush1.bf16.msra.mxu1 %v2369_v26  ;;  %p2192_p6 = pnand %p2191_p5, %p2185_p2 }
  0x40   :  { %564 = vmatprep.subr.bf16.mxu0 %v2373_v27  ;;  %605 = vmatprep.subr.bf16.mxu1 %v2375_v28 }
  0x42   :  { %1766 = vmatmul.mubr.msk.bf16.gmra.mrb[8].mxu0 %vm161_vm0, %v1939_v29  ;;  %1770 = vmatmul.mubr.msk.bf16.gmra.mrb[8].mxu1 %vm161_vm0, %v1939_v29 }
  0x43   :  { %565 = vmatpush1.bf16.msra.mxu0 %v2382_v30  ;;  %606 = vmatpush1.bf16.msra.mxu1 %v2384_v31 }
  0x44   :  { %566 = vmatprep.subr.bf16.mxu0 %v2388_v32  ;;  %607 = vmatprep.subr.bf16.mxu1 %v2392_v33 }
  0x45   :  { %236 = vmatprep.mubr.bf16.mxu0 %v2966_v0  ;;  %309 = vmatprep.mubr.bf16.mxu1 %v2966_v0 }
  0x47   :  { %567 = vmatpush1.bf16.msra.mxu0 %v2396_v34  ;;  %608 = vmatpush1.bf16.msra.mxu1 %v2398_v35 }
  0x48   :  { %568 = vmatprep.subr.bf16.mxu0 %v2402_v36  ;;  %609 = vmatprep.subr.bf16.mxu1 %v2409_v38 }
  0x4a   :  { %1767 = vmatmul.mubr.msk.bf16.gmra.mrb[12].mxu0 %vm161_vm0, %v1952_v37  ;;  %1771 = vmatmul.mubr.msk.bf16.gmra.mrb[12].mxu1 %vm161_vm0, %v1952_v37 }
  0x4b   :  { %569 = vmatpush1.bf16.msra.mxu0 %v2413_v39  ;;  %610 = vmatpush1.bf16.msra.mxu1 %v2415_v40 }
  0x4c   :  { %570 = vmatprep.subr.bf16.mxu0 %v2422_v42  ;;  %611 = vmatprep.subr.bf16.mxu1 %v2424_v43 }
  0x4d   :  { %588 = vmatprep.mubr.bf16.mxu0 %v2966_v0  ;;  %629 = vmatprep.mubr.bf16.mxu1 %v2966_v0 }
  0x4f   :  { %571 = vmatpush1.bf16.msra.mxu0 %v2434_v47  ;;  %612 = vmatpush1.bf16.msra.mxu1 %v2436_v48 }
  0x50   :  { %687 = vmatprep.subr.bf16.mxu0 %v2318_v10  ;;  %728 = vmatprep.subr.bf16.mxu1 %v2320_v11 }
  0x52   :  { %589 = vmatmul.mubr.bf16.vlgmr.msra.gmra.mrb[16].mxu0 %v2220_v50  ;;  %630 = vmatmul.mubr.bf16.vlgmr.msra.gmra.mrb[16].mxu1 %v2220_v50 }
  0x53   :  { %688 = vmatpush1.bf16.msra.mxu0 %v2322_v12  ;;  %729 = vmatpush1.bf16.msra.mxu1 %v2324_v13 }
  0x54   :  { %689 = vmatprep.subr.bf16.mxu0 %v2327_v14  ;;  %730 = vmatprep.subr.bf16.mxu1 %v2330_v15 }
  0x55   :  { %719 = vmatprep.mubr.bf16.mxu0 %v2966_v0  ;;  %760 = vmatprep.mubr.bf16.mxu1 %v2966_v0 }
  0x57   :  { %690 = vmatpush1.bf16.msra.mxu0 %v2334_v16  ;;  %731 = vmatpush1.bf16.msra.mxu1 %v2338_v17 }
  0x58   :  { %691 = vmatprep.subr.bf16.mxu0 %v2342_v18  ;;  %732 = vmatprep.subr.bf16.mxu1 %v2349_v20 }
  0x5b   :  { %692 = vmatpush1.bf16.msra.mxu0 %v2351_v21  ;;  %733 = vmatpush1.bf16.msra.mxu1 %v2355_v22 }
  0x5c   :  { %693 = vmatprep.subr.bf16.mxu0 %v2359_v23  ;;  %734 = vmatprep.subr.bf16.mxu1 %v2361_v24 }
  0x5f   :  { %694 = vmatpush1.bf16.msra.mxu0 %v2365_v25  ;;  %735 = vmatpush1.bf16.msra.mxu1 %v2369_v26 }
  0x60   :  { %695 = vmatprep.subr.bf16.mxu0 %v2373_v27  ;;  %736 = vmatprep.subr.bf16.mxu1 %v2375_v28 }
  0x63   :  { %696 = vmatpush1.bf16.msra.mxu0 %v2382_v30  ;;  %737 = vmatpush1.bf16.msra.mxu1 %v2384_v31 }
  0x64   :  { %697 = vmatprep.subr.bf16.mxu0 %v2388_v32  ;;  %738 = vmatprep.subr.bf16.mxu1 %v2392_v33 }
  0x67   :  { %698 = vmatpush1.bf16.msra.mxu0 %v2396_v34  ;;  %739 = vmatpush1.bf16.msra.mxu1 %v2398_v35 }
  0x68   :  { %699 = vmatprep.subr.bf16.mxu0 %v2402_v36  ;;  %740 = vmatprep.subr.bf16.mxu1 %v2409_v38 }
  0x6b   :  { %700 = vmatpush1.bf16.msra.mxu0 %v2413_v39  ;;  %741 = vmatpush1.bf16.msra.mxu1 %v2415_v40 }
  0x6c   :  { %701 = vmatprep.subr.bf16.mxu0 %v2422_v42  ;;  %742 = vmatprep.subr.bf16.mxu1 %v2424_v43 }
  0x6f   :  { %702 = vmatpush1.bf16.msra.mxu0 %v2434_v47  ;;  %743 = vmatpush1.bf16.msra.mxu1 %v2436_v48 }
  0x70   :  { %818 = vmatprep.subr.bf16.mxu0 %v2318_v10  ;;  %859 = vmatprep.subr.bf16.mxu1 %v2320_v11 }
 0x105   :  { %v2489_v59 = vpop.f32.mrb[0].mxu0  ;;  %v2491_v60 = vpop.f32.mrb[0].mxu1 }
 0x106   :  { %v210_v63 = vpop.f32.mrb[1].mxu0  ;;  %v283_v1 = vpop.f32.mrb[1].mxu1 }
 0x107   :  { %v212_v3 = vpop.f32.mrb[2].mxu0  ;;  %v285_v4 = vpop.f32.mrb[2].mxu1 }
 0x108   :  { %v2495_v5 = vadd.f32 %v212_v3, %v84_v62  ;;  %v214_v6 = vpop.f32.mrb[3].mxu0  ;;  %v2498_v7 = vadd.f32 %v285_v4, %v2487_v58  ;;  %v287_v8 = vpop.f32.mrb[3].mxu1 }
 0x109   :  { %v2500_v9 = vadd.f32 %v214_v6, %v88_v2  ;;  %v2503_v19 = vadd.f32 %v287_v8, %v2493_v61 }
 0x10d   :  { %v218_v29 = vpop.f32.mrb[4].mxu0  ;;  %v291_v37 = vpop.f32.mrb[4].mxu1 }
 0x10e   :  { %v2505_v45 = vadd.f32 %v218_v29, %v84_v62  ;;  %v220_v46 = vpop.f32.mrb[5].mxu0  ;;  %v2508_v49 = vadd.f32 %v291_v37, %v2487_v58  ;;  %v293_v50 = vpop.f32.mrb[5].mxu1 }
 0x10f   :  { %v2510_v51 = vadd.f32 %v220_v46, %v88_v2  ;;  %v222_v52 = vpop.f32.mrb[6].mxu0  ;;  %v2513_v53 = vadd.f32 %v293_v50, %v2493_v61  ;;  %v295_v54 = vpop.f32.mrb[6].mxu1 }
 0x110   :  { %v2515_v55 = vadd.f32 %v222_v52, %v84_v62  ;;  %v224_v56 = vpop.f32.mrb[7].mxu0  ;;  %v2518_v57 = vadd.f32 %v295_v54, %v2487_v58  ;;  %v297_v3 = vpop.f32.mrb[7].mxu1 }
 0x111   :  { %2968 = vst [vmem:[#allocation15_spill] sm:$0xff] %v2510_v51  ;;  %2969 = vst [vmem:[#allocation16_spill] sm:$0xff] %v2513_v53  ;;  %v2520_v4 = vadd.f32 %v224_v56, %v88_v2  ;;  %v2523_v6 = vadd.f32 %v297_v3, %v2493_v61 }
 0x112   :  { %2970 = vst [vmem:[#allocation17_spill] sm:$0xff] %v2515_v55  ;;  %2971 = vst [vmem:[#allocation18_spill] sm:$0xff] %v2518_v57 }
 0x113   :  { %2972 = vst [vmem:[#allocation19_spill] sm:$0xff] %v2520_v4  ;;  %2973 = vst [vmem:[#allocation20_spill] sm:$0xff] %v2523_v6 }
 0x115   :  { %v228_v8 = vpop.f32.mrb[8].mxu0  ;;  %v301_v29 = vpop.f32.mrb[8].mxu1 }
 0x116   :  { %v2525_v37 = vadd.f32 %v228_v8, %v84_v62  ;;  %v230_v46 = vpop.f32.mrb[9].mxu0  ;;  %v2528_v50 = vadd.f32 %v301_v29, %v2487_v58  ;;  %v303_v52 = vpop.f32.mrb[9].mxu1 }
 0x117   :  { %v2530_v44 = vadd.f32 %v230_v46, %v88_v2  ;;  %v232_v0 = vpop.f32.mrb[10].mxu0  ;;  %v2533_v54 = vadd.f32 %v303_v52, %v2493_v61  ;;  %v305_v56 = vpop.f32.mrb[10].mxu1 }
 0x118   :  { %2974 = vst [vmem:[#allocation21_spill] sm:$0xff] %v2525_v37  ;;  %2975 = vst [vmem:[#allocation22_spill] sm:$0xff] %v2528_v50  ;;  %v2535_v4 = vadd.f32 %v232_v0, %v84_v62  ;;  %v234_v3 = vpop.f32.mrb[11].mxu0  ;;  %v2538_v6 = vadd.f32 %v305_v56, %v2487_v58  ;;  %v307_v8 = vpop.f32.mrb[11].mxu1 }
 0x119   :  { %2976 = vst [vmem:[#allocation23_spill] sm:$0xff] %v2530_v44  ;;  %2977 = vst [vmem:[#allocation24_spill] sm:$0xff] %v2533_v54  ;;  %v2540_v37 = vadd.f32 %v234_v3, %v88_v2  ;;  %v2543_v29 = vadd.f32 %v307_v8, %v2493_v61 }
 0x11a   :  { %2978 = vst [vmem:[#allocation25_spill] sm:$0xff] %v2535_v4  ;;  %2979 = vst [vmem:[#allocation26_spill] sm:$0xff] %v2538_v6 }
 0x11b   :  { %2980 = vst [vmem:[#allocation27_spill] sm:$0xff] %v2540_v37  ;;  %2981 = vst [vmem:[#allocation28_spill] sm:$0xff] %v2543_v29 }
 0x11d   :  { %v238_v50 = vpop.f32.mrb[12].mxu0  ;;  %v311_v46 = vpop.f32.mrb[12].mxu1 }
 0x11e   :  { %v2545_v44 = vadd.f32 %v238_v50, %v84_v62  ;;  %v240_v57 = vpop.f32.mrb[13].mxu0  ;;  %v2548_v52 = vadd.f32 %v311_v46, %v2487_v58  ;;  %v313_v0 = vpop.f32.mrb[13].mxu1 }
 0x11f   :  { %v2550_v4 = vadd.f32 %v240_v57, %v88_v2  ;;  %v242_v54 = vpop.f32.mrb[14].mxu0  ;;  %v2553_v56 = vadd.f32 %v313_v0, %v2493_v61  ;;  %v315_v3 = vpop.f32.mrb[14].mxu1  ;;  %v209_v57 = vadd.f32 %v2489_v59, %v84_v62  ;;  %v211_v0 = vadd.f32 %v210_v63, %v88_v2 }
 0x120   :  { %2982 = vst [vmem:[#allocation29_spill] sm:$0xff] %v2545_v44  ;;  %2983 = vst [vmem:[#allocation30_spill] sm:$0xff] %v2548_v52  ;;  %v2555_v37 = vadd.f32 %v242_v54, %v84_v62  ;;  %v244_v8 = vpop.f32.mrb[15].mxu0  ;;  %v2558_v29 = vadd.f32 %v315_v3, %v2487_v58  ;;  %v317_v50 = vpop.f32.mrb[15].mxu1 }
 0x121   :  { %2984 = vst [vmem:[#allocation31_spill] sm:$0xff] %v2550_v4  ;;  %2985 = vst [vmem:[#allocation32_spill] sm:$0xff] %v2553_v56  ;;  %v2560_v44 = vadd.f32 %v244_v8, %v88_v2  ;;  %v2563_v46 = vadd.f32 %v317_v50, %v2493_v61  ;;  %v282_v4 = vadd.f32 %v2491_v60, %v2487_v58 }
 0x122   :  { %2986 = vst [vmem:[#allocation33_spill] sm:$0xff] %v2555_v37  ;;  %2987 = vst [vmem:[#allocation34_spill] sm:$0xff] %v2558_v29  ;;  %v284_v56 = vadd.f32 %v283_v1, %v2493_v61 }
 0x123   :  { %2988 = vst [vmem:[#allocation35_spill] sm:$0xff] %v2560_v44  ;;  %2989 = vst [vmem:[#allocation36_spill] sm:$0xff] %v2563_v46 }
 0x125   :  { %v590_v54 = vpop.f32.mrb[16].mxu0  ;;  %v631_v37 = vpop.f32.mrb[16].mxu1 }
 0x126   :  { %v638_v52 = vadd.f32 %v590_v54, %v209_v57  ;;  %v640_v6 = vadd.f32 %v631_v37, %v282_v4  ;;  %v592_v3 = vpop.f32.mrb[17].mxu0  ;;  %v633_v29 = vpop.f32.mrb[17].mxu1  ;;  %v2991_v57 = vmov 0.0  }
 0x127   :  { %v639_v55 = vadd.f32 %v592_v3, %v211_v0  ;;  %v641_v8 = vadd.f32 %v633_v29, %v284_v56  ;;  %v594_v44 = vpop.f32.mrb[18].mxu0  ;;  %v635_v53 = vpop.f32.mrb[18].mxu1  ;;  %v1818_v0 = vsel %vm1817_vm3, 1.0, %v2991_v57 }
 0x128   :  { %v1804_v50 = vmul.f32 -1.442695, %v638_v52  ;;  %v595_v46 = vpop.f32.mrb[19].mxu0  ;;  %v636_v51 = vpop.f32.mrb[19].mxu1  ;;  %v1806_v58 = vmul.f32 -1.442695, %v640_v6  ;;  %936 = vperm.xlu0 %1894, %v1818_v0  }
 0x129   :  { %v1805_v59 = vmul.f32 -1.442695, %v639_v55  ;;  %v2990_v46 = vmov 0  }
 0x12a   :  { %1973 = vpow2.f32 %v1804_v50 }
 0x12b   :  { %1975 = vpow2.f32 %v1805_v59 }
 0x12c   :  { %1977 = vtanh.f32 %v641_v8 }
 0x12d   :  { %1979 = vpow2.f32 %v1806_v58 }
 0x134   :  { %v1974_v60 = vpop.eup %1973 }
 0x135   :  { %v651_v62 = vadd.f32 1.0, %v1974_v60  ;;  %v1976_v61 = vpop.eup %1975 }
 0x136   :  { %v652_v63 = vadd.f32 1.0, %v1976_v61  ;;  %v1978_v1 = vpop.eup %1977 }
 0x137   :  { %1981 = vrcp.f32 %v651_v62  ;;  %v1980_v2 = vpop.eup %1979 }
 0x138   :  { %1983 = vrcp.f32 %v652_v63  ;;  %v653_v37 = vadd.f32 1.0, %v1980_v2 }
 0x13a   :  { %1985 = vrcp.f32 %v653_v37 }
 0x141   :  { %v1982_v4 = vpop.eup %1981 }
 0x142   :  { %v662_v44 = vmul.f32 %v1982_v4, %v1978_v1  ;;  %v1984_v53 = vpop.eup %1983 }
 0x143   :  { %v661_v29 = vmul.f32 0.0, %v1984_v53 }
 0x144   :  { %v1986_v55 = vpop.eup %1985 }
 0x145   :  { %v2569_v51 = vadd.f32 %v662_v44, %v661_v29 }
 0x147   :  { %1987 = vtanh.f32 %v2569_v51 }
 0x151   :  { %v1988_v6 = vpop.eup %1987 }
 0x152   :  { %v2572_v52 = vmul.f32 %v1988_v6, %v1986_v55 }
 0x154   :  { %v686_v56 = vpack.c.bf16 %v2572_v52, %v2572_v52 }
 0x156   :  { %720 = vmatmul.mubr.bf16.vlgmr.msra.gmra.mrb[20].mxu0 %v686_v56  ;;  %761 = vmatmul.mubr.bf16.vlgmr.msra.gmra.mrb[20].mxu1 %v686_v56 }
 0x157   :  { %819 = vmatpush1.bf16.msra.mxu0 %v2322_v12  ;;  %860 = vmatpush1.bf16.msra.mxu1 %v2324_v13 }
 0x158   :  { %820 = vmatprep.subr.bf16.mxu0 %v2327_v14  ;;  %861 = vmatprep.subr.bf16.mxu1 %v2330_v15 }
 0x159   :  { %850 = vmatprep.mubr.bf16.mxu0 %v2990_v46  ;;  %891 = vmatprep.mubr.bf16.mxu1 %v2990_v46 }
 0x15b   :  { %821 = vmatpush1.bf16.msra.mxu0 %v2334_v16  ;;  %862 = vmatpush1.bf16.msra.mxu1 %v2338_v17 }
 0x15c   :  { %822 = vmatprep.subr.bf16.mxu0 %v2342_v18  ;;  %863 = vmatprep.subr.bf16.mxu1 %v2349_v20 }
 0x15f   :  { %823 = vmatpush1.bf16.msra.mxu0 %v2351_v21  ;;  %864 = vmatpush1.bf16.msra.mxu1 %v2355_v22 }
 0x160   :  { %824 = vmatprep.subr.bf16.mxu0 %v2359_v23  ;;  %865 = vmatprep.subr.bf16.mxu1 %v2361_v24 }
 0x163   :  { %825 = vmatpush1.bf16.msra.mxu0 %v2365_v25  ;;  %866 = vmatpush1.bf16.msra.mxu1 %v2369_v26 }
 0x164   :  { %826 = vmatprep.subr.bf16.mxu0 %v2373_v27  ;;  %867 = vmatprep.subr.bf16.mxu1 %v2375_v28 }
 0x167   :  { %827 = vmatpush1.bf16.msra.mxu0 %v2382_v30  ;;  %868 = vmatpush1.bf16.msra.mxu1 %v2384_v31 }
 0x168   :  { %828 = vmatprep.subr.bf16.mxu0 %v2388_v32  ;;  %869 = vmatprep.subr.bf16.mxu1 %v2392_v33 }
 0x16b   :  { %829 = vmatpush1.bf16.msra.mxu0 %v2396_v34  ;;  %870 = vmatpush1.bf16.msra.mxu1 %v2398_v35 }
 0x16c   :  { %830 = vmatprep.subr.bf16.mxu0 %v2402_v36  ;;  %871 = vmatprep.subr.bf16.mxu1 %v2409_v38 }
 0x16f   :  { %831 = vmatpush1.bf16.msra.mxu0 %v2413_v39  ;;  %872 = vmatpush1.bf16.msra.mxu1 %v2415_v40 }
 0x170   :  { %832 = vmatprep.subr.bf16.mxu0 %v2422_v42  ;;  %873 = vmatprep.subr.bf16.mxu1 %v2424_v43 }
 0x173   :  { %833 = vmatpush1.bf16.msra.mxu0 %v2434_v47  ;;  %874 = vmatpush1.bf16.msra.mxu1 %v2436_v48 }
 0x174   :  { %949 = vmatprep.subr.bf16.mxu0 %v2318_v10  ;;  %990 = vmatprep.subr.bf16.mxu1 %v2320_v11 }
 0x229   :  { %v721_v54 = vpop.f32.mrb[20].mxu0  ;;  %v762_v3 = vpop.f32.mrb[20].mxu1 }
 0x22a   :  { %v769_v8 = vadd.f32 %v721_v54, %v2495_v5  ;;  %v771_v50 = vadd.f32 %v762_v3, %v2498_v7  ;;  %v723_v59 = vpop.f32.mrb[21].mxu0  ;;  %v764_v58 = vpop.f32.mrb[21].mxu1 }
 0x22b   :  { %v770_v60 = vadd.f32 %v723_v59, %v2500_v9  ;;  %v772_v62 = vadd.f32 %v764_v58, %v2503_v19  ;;  %v725_v61 = vpop.f32.mrb[22].mxu0  ;;  %v766_v63 = vpop.f32.mrb[22].mxu1 }
 0x22c   :  { %v1809_v1 = vmul.f32 -1.442695, %v769_v8  ;;  %v726_v2 = vpop.f32.mrb[23].mxu0  ;;  %v767_v4 = vpop.f32.mrb[23].mxu1  ;;  %v1811_v53 = vmul.f32 -1.442695, %v771_v50 }
 0x22d   :  { %v1810_v44 = vmul.f32 -1.442695, %v770_v60  ;;  %v1897_v8 = vpop.permute.xlu0 %1896 }
 0x22e   :  { %1989 = vpow2.f32 %v1809_v1  ;;  %v1899_v59 = vunpack.i.h.bf16 %v1897_v8  ;;  %v1898_v58 = vunpack.i.l.bf16 %v1897_v8 }
 0x22f   :  { %1991 = vpow2.f32 %v1810_v44 }
 0x230   :  { %1993 = vtanh.f32 %v772_v62  ;;  %v677_v61 = vmul.f32 %v1898_v58, %v2572_v52 }
 0x231   :  { %1995 = vpow2.f32 %v1811_v53 }
 0x238   :  { %v1990_v37 = vpop.eup %1989 }
 0x239   :  { %v782_v29 = vadd.f32 1.0, %v1990_v37  ;;  %v1992_v5 = vpop.eup %1991 }
 0x23a   :  { %v783_v7 = vadd.f32 1.0, %v1992_v5  ;;  %v1994_v9 = vpop.eup %1993  ;;  %v2992_v5 = vld [vmem:[#allocation15_spill] sm:$0xff] }
 0x23b   :  { %1997 = vrcp.f32 %v782_v29  ;;  %v1996_v55 = vpop.eup %1995 }
 0x23c   :  { %1999 = vrcp.f32 %v783_v7  ;;  %v784_v0 = vadd.f32 1.0, %v1996_v55 }
 0x23e   :  { %2001 = vrcp.f32 %v784_v0 }
 0x245   :  { %v1998_v19 = vpop.eup %1997 }
 0x246   :  { %v793_v6 = vmul.f32 %v1998_v19, %v1994_v9  ;;  %v2000_v56 = vpop.eup %1999  ;;  %v2993_v9 = vld [vmem:[#allocation16_spill] sm:$0xff] }
 0x247   :  { %v792_v54 = vmul.f32 %v2000_v56, %v2569_v51  ;;  %v1823_v51 = vsel %vm1822_vm4, 1.0, %v2991_v57 }
 0x248   :  { %v2002_v50 = vpop.eup %2001  ;;  %1067 = vperm.xlu1 %1900, %v1823_v51  }
 0x249   :  { %v2617_v3 = vadd.f32 %v793_v6, %v792_v54 }
 0x24b   :  { %2003 = vtanh.f32 %v2617_v3 }
 0x255   :  { %v2004_v60 = vpop.eup %2003 }
 0x256   :  { %v796_v62 = vmul.f32 %v2004_v60, %v2002_v50 }
 0x258   :  { %v817_v63 = vpack.c.bf16 %v796_v62, %v796_v62  ;;  %v808_v1 = vmul.f32 %v1899_v59, %v796_v62 }
 0x25a   :  { %851 = vmatmul.mubr.bf16.vlgmr.msra.gmra.mrb[24].mxu0 %v817_v63  ;;  %892 = vmatmul.mubr.bf16.vlgmr.msra.gmra.mrb[24].mxu1 %v817_v63  ;;  %v2621_v2 = vadd.f32 %v808_v1, %v677_v61 }
 0x25b   :  { %950 = vmatpush1.bf16.msra.mxu0 %v2322_v12  ;;  %991 = vmatpush1.bf16.msra.mxu1 %v2324_v13 }
 0x25c   :  { %951 = vmatprep.subr.bf16.mxu0 %v2327_v14  ;;  %992 = vmatprep.subr.bf16.mxu1 %v2330_v15 }
 0x25d   :  { %981 = vmatprep.mubr.bf16.mxu0 %v2990_v46  ;;  %1022 = vmatprep.mubr.bf16.mxu1 %v2990_v46 }
 0x25f   :  { %952 = vmatpush1.bf16.msra.mxu0 %v2334_v16  ;;  %993 = vmatpush1.bf16.msra.mxu1 %v2338_v17 }
 0x260   :  { %953 = vmatprep.subr.bf16.mxu0 %v2342_v18  ;;  %994 = vmatprep.subr.bf16.mxu1 %v2349_v20 }
 0x263   :  { %954 = vmatpush1.bf16.msra.mxu0 %v2351_v21  ;;  %995 = vmatpush1.bf16.msra.mxu1 %v2355_v22 }
 0x264   :  { %955 = vmatprep.subr.bf16.mxu0 %v2359_v23  ;;  %996 = vmatprep.subr.bf16.mxu1 %v2361_v24 }
 0x267   :  { %956 = vmatpush1.bf16.msra.mxu0 %v2365_v25  ;;  %997 = vmatpush1.bf16.msra.mxu1 %v2369_v26 }
 0x268   :  { %957 = vmatprep.subr.bf16.mxu0 %v2373_v27  ;;  %998 = vmatprep.subr.bf16.mxu1 %v2375_v28 }
 0x26b   :  { %958 = vmatpush1.bf16.msra.mxu0 %v2382_v30  ;;  %999 = vmatpush1.bf16.msra.mxu1 %v2384_v31 }
 0x26c   :  { %959 = vmatprep.subr.bf16.mxu0 %v2388_v32  ;;  %1000 = vmatprep.subr.bf16.mxu1 %v2392_v33 }
 0x26f   :  { %960 = vmatpush1.bf16.msra.mxu0 %v2396_v34  ;;  %1001 = vmatpush1.bf16.msra.mxu1 %v2398_v35 }
 0x270   :  { %961 = vmatprep.subr.bf16.mxu0 %v2402_v36  ;;  %1002 = vmatprep.subr.bf16.mxu1 %v2409_v38 }
 0x273   :  { %962 = vmatpush1.bf16.msra.mxu0 %v2413_v39  ;;  %1003 = vmatpush1.bf16.msra.mxu1 %v2415_v40 }
 0x274   :  { %963 = vmatprep.subr.bf16.mxu0 %v2422_v42  ;;  %1004 = vmatprep.subr.bf16.mxu1 %v2424_v43 }
 0x277   :  { %964 = vmatpush1.bf16.msra.mxu0 %v2434_v47  ;;  %1005 = vmatpush1.bf16.msra.mxu1 %v2436_v48 }
 0x278   :  { %1080 = vmatprep.subr.bf16.mxu0 %v2318_v10  ;;  %1121 = vmatprep.subr.bf16.mxu1 %v2320_v11 }
 0x32d   :  { %v852_v52 = vpop.f32.mrb[24].mxu0  ;;  %v893_v4 = vpop.f32.mrb[24].mxu1 }
 0x32e   :  { %v900_v44 = vadd.f32 %v852_v52, %v2505_v45  ;;  %v902_v53 = vadd.f32 %v893_v4, %v2508_v49  ;;  %v854_v37 = vpop.f32.mrb[25].mxu0  ;;  %v895_v29 = vpop.f32.mrb[25].mxu1 }
 0x32f   :  { %v901_v7 = vadd.f32 %v854_v37, %v2992_v5  ;;  %v903_v55 = vadd.f32 %v895_v29, %v2993_v9  ;;  %v856_v19 = vpop.f32.mrb[26].mxu0  ;;  %v897_v6 = vpop.f32.mrb[26].mxu1 }
 0x330   :  { %v1814_v56 = vmul.f32 -1.442695, %v900_v44  ;;  %v857_v0 = vpop.f32.mrb[27].mxu0  ;;  %v898_v54 = vpop.f32.mrb[27].mxu1  ;;  %v1816_v50 = vmul.f32 -1.442695, %v902_v53 }
 0x331   :  { %v1815_v8 = vmul.f32 -1.442695, %v901_v7  ;;  %v937_v37 = vpop.permute.xlu0 %936 }
 0x332   :  { %2005 = vpow2.f32 %v1814_v56 }
 0x333   :  { %2007 = vpow2.f32 %v1815_v8 }
 0x334   :  { %2009 = vtanh.f32 %v903_v55 }
 0x335   :  { %2011 = vpow2.f32 %v1816_v50 }
 0x33c   :  { %v2006_v59 = vpop.eup %2005 }
 0x33d   :  { %v913_v58 = vadd.f32 1.0, %v2006_v59  ;;  %v2008_v45 = vpop.eup %2007 }
 0x33e   :  { %v914_v49 = vadd.f32 1.0, %v2008_v45  ;;  %v2010_v60 = vpop.eup %2009 }
 0x33f   :  { %2013 = vrcp.f32 %v913_v58  ;;  %v2012_v62 = vpop.eup %2011 }
 0x340   :  { %2015 = vrcp.f32 %v914_v49  ;;  %v915_v51 = vadd.f32 1.0, %v2012_v62 }
 0x342   :  { %2017 = vrcp.f32 %v915_v51 }
 0x349   :  { %v2014_v61 = vpop.eup %2013 }
 0x34a   :  { %v924_v63 = vmul.f32 %v2014_v61, %v2010_v60  ;;  %v2016_v1 = vpop.eup %2015 }
 0x34b   :  { %v923_v52 = vmul.f32 %v2016_v1, %v2617_v3 }
 0x34c   :  { %v2018_v44 = vpop.eup %2017 }
 0x34d   :  { %v2664_v4 = vadd.f32 %v924_v63, %v923_v52  ;;  %v1068_v52 = vpop.permute.xlu1 %1067 }
 0x34f   :  { %2019 = vtanh.f32 %v2664_v4 }
 0x359   :  { %v2020_v53 = vpop.eup %2019 }
 0x35a   :  { %v927_v29 = vmul.f32 %v2020_v53, %v2018_v44 }
 0x35c   :  { %v939_v5 = vmul.f32 %v937_v37, %v927_v29  ;;  %v948_v7 = vpack.c.bf16 %v927_v29, %v927_v29 }
 0x35e   :  { %v2668_v9 = vadd.f32 %v939_v5, %v2621_v2  ;;  %982 = vmatmul.mubr.bf16.vlgmr.msra.gmra.mrb[28].mxu0 %v948_v7  ;;  %1023 = vmatmul.mubr.bf16.vlgmr.msra.gmra.mrb[28].mxu1 %v948_v7  ;;  %v2717_v5 = vld [vmem:[#allocation6] ss:$16 sps:$4 sm:$0xff]   ;;  %v2723_v7 = vld [vmem:[#allocation6 + $0x24] ss:$16 sps:$4 sm:$0xff]  }
 0x35f   :  { %1081 = vmatpush1.bf16.msra.mxu0 %v2322_v12  ;;  %1122 = vmatpush1.bf16.msra.mxu1 %v2324_v13  ;;  %v1828_v12 = vsel %vm1827_vm5, 1.0, %v2991_v57 }
 0x360   :  { %1082 = vmatprep.subr.bf16.mxu0 %v2327_v14  ;;  %1123 = vmatprep.subr.bf16.mxu1 %v2330_v15  ;;  %v2994_v15 = vld [vmem:[#allocation17_spill] sm:$0xff] }
 0x361   :  { %1112 = vmatprep.mubr.bf16.mxu0 %v2990_v46  ;;  %1153 = vmatprep.mubr.bf16.mxu1 %v2990_v46 }
 0x362   :  { %1198 = vperm.xlu1 %1900, %v1828_v12   ;;  %v2726_v12 = vld [vmem:[#allocation6 + $0x2c] ss:$16 sps:$4 sm:$0xff]  }
 0x363   :  { %1083 = vmatpush1.bf16.msra.mxu0 %v2334_v16  ;;  %1124 = vmatpush1.bf16.msra.mxu1 %v2338_v17  ;;  %v2995_v17 = vld [vmem:[#allocation18_spill] sm:$0xff] }
 0x364   :  { %1084 = vmatprep.subr.bf16.mxu0 %v2342_v18  ;;  %1125 = vmatprep.subr.bf16.mxu1 %v2349_v20 }
 0x367   :  { %1085 = vmatpush1.bf16.msra.mxu0 %v2351_v21  ;;  %1126 = vmatpush1.bf16.msra.mxu1 %v2355_v22  ;;  %v2996_v22 = vld [vmem:[#allocation19_spill] sm:$0xff] }
 0x368   :  { %1086 = vmatprep.subr.bf16.mxu0 %v2359_v23  ;;  %1127 = vmatprep.subr.bf16.mxu1 %v2361_v24  ;;  %v2997_v24 = vld [vmem:[#allocation20_spill] sm:$0xff] }
 0x36b   :  { %1087 = vmatpush1.bf16.msra.mxu0 %v2365_v25  ;;  %1128 = vmatpush1.bf16.msra.mxu1 %v2369_v26 }
 0x36c   :  { %1088 = vmatprep.subr.bf16.mxu0 %v2373_v27  ;;  %1129 = vmatprep.subr.bf16.mxu1 %v2375_v28 }
 0x36f   :  { %1089 = vmatpush1.bf16.msra.mxu0 %v2382_v30  ;;  %1130 = vmatpush1.bf16.msra.mxu1 %v2384_v31 }
 0x370   :  { %1090 = vmatprep.subr.bf16.mxu0 %v2388_v32  ;;  %1131 = vmatprep.subr.bf16.mxu1 %v2392_v33 }
 0x373   :  { %1091 = vmatpush1.bf16.msra.mxu0 %v2396_v34  ;;  %1132 = vmatpush1.bf16.msra.mxu1 %v2398_v35 }
 0x374   :  { %1092 = vmatprep.subr.bf16.mxu0 %v2402_v36  ;;  %1133 = vmatprep.subr.bf16.mxu1 %v2409_v38 }
 0x377   :  { %1093 = vmatpush1.bf16.msra.mxu0 %v2413_v39  ;;  %1134 = vmatpush1.bf16.msra.mxu1 %v2415_v40 }
 0x378   :  { %1094 = vmatprep.subr.bf16.mxu0 %v2422_v42  ;;  %1135 = vmatprep.subr.bf16.mxu1 %v2424_v43 }
 0x37b   :  { %1095 = vmatpush1.bf16.msra.mxu0 %v2434_v47  ;;  %1136 = vmatpush1.bf16.msra.mxu1 %v2436_v48 }
 0x37c   :  { %1211 = vmatprep.subr.bf16.mxu0 %v2318_v10  ;;  %1252 = vmatprep.subr.bf16.mxu1 %v2320_v11 }
 0x431   :  { %v983_v13 = vpop.f32.mrb[28].mxu0  ;;  %v1024_v14 = vpop.f32.mrb[28].mxu1 }
 0x432   :  { %v1031_v16 = vadd.f32 %v983_v13, %v2994_v15  ;;  %v1033_v18 = vadd.f32 %v1024_v14, %v2995_v17  ;;  %v985_v20 = vpop.f32.mrb[29].mxu0  ;;  %v1026_v21 = vpop.f32.mrb[29].mxu1  ;;  %v2734_v13 = vld [vmem:[#allocation6 + $0x28] ss:$16 sps:$4 sm:$0xff]   ;;  %v2737_v14 = vld [vmem:[#allocation6 + $0x44] ss:$16 sps:$4 sm:$0xff]  }
 0x433   :  { %v1032_v23 = vadd.f32 %v985_v20, %v2996_v22  ;;  %v1034_v3 = vadd.f32 %v1026_v21, %v2997_v24  ;;  %v987_v10 = vpop.f32.mrb[30].mxu0  ;;  %v1028_v2 = vpop.f32.mrb[30].mxu1  ;;  %v2740_v15 = vld [vmem:[#allocation6 + $0x4c] ss:$16 sps:$4 sm:$0xff]   ;;  %v2746_v17 = vld [vmem:[#allocation6 + $0x48] ss:$16 sps:$4 sm:$0xff]  }
 0x434   :  { %v1819_v11 = vmul.f32 -1.442695, %v1031_v16  ;;  %v988_v55 = vpop.f32.mrb[31].mxu0  ;;  %v1029_v19 = vpop.f32.mrb[31].mxu1  ;;  %v1821_v56 = vmul.f32 -1.442695, %v1033_v18 }
 0x435   :  { %v1820_v6 = vmul.f32 -1.442695, %v1032_v23  ;;  %v2743_v16 = vld [vmem:[#allocation6 + $0x40] ss:$16 sps:$4 sm:$0xff]   ;;  %v2749_v18 = vld [vmem:[#allocation6 + $0x64] ss:$16 sps:$4 sm:$0xff]  }
 0x436   :  { %2021 = vpow2.f32 %v1819_v11  ;;  %v2752_v20 = vld [vmem:[#allocation6 + $0x6c] ss:$16 sps:$4 sm:$0xff]  }
 0x437   :  { %2023 = vpow2.f32 %v1820_v6 }
 0x438   :  { %2025 = vtanh.f32 %v1034_v3 }
 0x439   :  { %2027 = vpow2.f32 %v1821_v56 }
 0x440   :  { %v2022_v0 = vpop.eup %2021 }
 0x441   :  { %v1044_v54 = vadd.f32 1.0, %v2022_v0  ;;  %v2024_v8 = vpop.eup %2023 }
 0x442   :  { %v1045_v50 = vadd.f32 1.0, %v2024_v8  ;;  %v2026_v59 = vpop.eup %2025 }
 0x443   :  { %2029 = vrcp.f32 %v1044_v54  ;;  %v2028_v58 = vpop.eup %2027 }
 0x444   :  { %2031 = vrcp.f32 %v1045_v50  ;;  %v1046_v62 = vadd.f32 1.0, %v2028_v58  ;;  %v1199_v58 = vpop.permute.xlu1 %1198 }
 0x446   :  { %2033 = vrcp.f32 %v1046_v62 }
 0x44d   :  { %v2030_v45 = vpop.eup %2029 }
 0x44e   :  { %v1055_v49 = vmul.f32 %v2030_v45, %v2026_v59  ;;  %v2032_v60 = vpop.eup %2031 }
 0x44f   :  { %v1054_v61 = vmul.f32 %v2032_v60, %v2664_v4  ;;  %v2720_v4 = vld [vmem:[#allocation6 + $0x8] ss:$16 sps:$4 sm:$0xff]  }
 0x450   :  { %v2034_v1 = vpop.eup %2033 }
 0x451   :  { %v2711_v63 = vadd.f32 %v1055_v49, %v1054_v61  ;;  %v2806_v61 = vld [vmem:[#allocation6 + $0x60] ss:$16 sps:$4 sm:$0xff]  }
 0x453   :  { %2035 = vtanh.f32 %v2711_v63 }
 0x45d   :  { %v2036_v51 = vpop.eup %2035 }
 0x45e   :  { %v1058_v44 = vmul.f32 %v2036_v51, %v2034_v1  ;;  %v2812_v1 = vld [vmem:[#allocation6 + $0x84] ss:$16 sps:$4 sm:$0xff]   ;;  %v2815_v51 = vld [vmem:[#allocation6 + $0x8c] ss:$16 sps:$4 sm:$0xff]  }
 0x460   :  { %v1070_v53 = vmul.f32 %v1068_v52, %v1058_v44  ;;  %v1079_v37 = vpack.c.bf16 %v1058_v44, %v1058_v44  ;;  %v2818_v52 = vld [vmem:[#allocation6 + $0x80] ss:$16 sps:$4 sm:$0xff]   ;;  %v2821_v44 = vld [vmem:[#allocation6 + $0x88] ss:$16 sps:$4 sm:$0xff]  }
 0x462   :  { %v2715_v29 = vadd.f32 %v1070_v53, %v2668_v9  ;;  %1113 = vmatmul.mubr.bf16.vlgmr.msra.gmra.mrb[32].mxu0 %v1079_v37  ;;  %1154 = vmatmul.mubr.bf16.vlgmr.msra.gmra.mrb[32].mxu1 %v1079_v37  ;;  %v2731_v9 = vld [vmem:[#allocation6 + $0x20] ss:$16 sps:$4 sm:$0xff]   ;;  %v2824_v53 = vld [vmem:[#allocation6 + $0xa4] ss:$16 sps:$4 sm:$0xff]   ;;  %v2827_v37 = vld [vmem:[#allocation6 + $0xac] ss:$16 sps:$4 sm:$0xff]  }
 0x463   :  { %1212 = vmatpush1.bf16.msra.mxu0 %v2717_v5  ;;  %1253 = vmatpush1.bf16.msra.mxu1 %v2720_v4 }
 0x464   :  { %1213 = vmatprep.subr.bf16.mxu0 %v2723_v7  ;;  %1254 = vmatprep.subr.bf16.mxu1 %v2726_v12 }
 0x465   :  { %1243 = vmatprep.mubr.bf16.mxu0 %v2990_v46  ;;  %1284 = vmatprep.mubr.bf16.mxu1 %v2990_v46 }
 0x467   :  { %1214 = vmatpush1.bf16.msra.mxu0 %v2731_v9  ;;  %1255 = vmatpush1.bf16.msra.mxu1 %v2734_v13 }
 0x468   :  { %1215 = vmatprep.subr.bf16.mxu0 %v2737_v14  ;;  %1256 = vmatprep.subr.bf16.mxu1 %v2740_v15 }
 0x46b   :  { %1216 = vmatpush1.bf16.msra.mxu0 %v2743_v16  ;;  %1257 = vmatpush1.bf16.msra.mxu1 %v2746_v17 }
 0x46c   :  { %1217 = vmatprep.subr.bf16.mxu0 %v2749_v18  ;;  %1258 = vmatprep.subr.bf16.mxu1 %v2752_v20 }
 0x46f   :  { %1218 = vmatpush1.bf16.msra.mxu0 %v2365_v25  ;;  %1259 = vmatpush1.bf16.msra.mxu1 %v2369_v26  ;;  %v2773_v25 = vld [vmem:[#allocation6 + $0x4] ss:$16 sps:$4 sm:$0xff]   ;;  %v2776_v26 = vld [vmem:[#allocation6 + $0xc] ss:$16 sps:$4 sm:$0xff]  }
 0x470   :  { %1219 = vmatprep.subr.bf16.mxu0 %v2373_v27  ;;  %1260 = vmatprep.subr.bf16.mxu1 %v2375_v28  ;;  %v1833_v27 = vsel %vm1832_vm6, 1.0, %v2991_v57 }
 0x471   :  { %1329 = vperm.xlu0 %1894, %v1833_v27   ;;  %v2833_v27 = vld [vmem:[#allocation6 + $0xa8] ss:$16 sps:$4 sm:$0xff]  }
 0x473   :  { %1220 = vmatpush1.bf16.msra.mxu0 %v2382_v30  ;;  %1261 = vmatpush1.bf16.msra.mxu1 %v2384_v31  ;;  %v2998_v31 = vld [vmem:[#allocation21_spill] sm:$0xff] }
 0x474   :  { %1221 = vmatprep.subr.bf16.mxu0 %v2388_v32  ;;  %1262 = vmatprep.subr.bf16.mxu1 %v2392_v33  ;;  %v2999_v33 = vld [vmem:[#allocation22_spill] sm:$0xff] }
 0x477   :  { %1222 = vmatpush1.bf16.msra.mxu0 %v2396_v34  ;;  %1263 = vmatpush1.bf16.msra.mxu1 %v2398_v35 }
 0x478   :  { %1223 = vmatprep.subr.bf16.mxu0 %v2402_v36  ;;  %1264 = vmatprep.subr.bf16.mxu1 %v2409_v38  ;;  %v3000_v38 = vld [vmem:[#allocation23_spill] sm:$0xff] }
 0x47b   :  { %1224 = vmatpush1.bf16.msra.mxu0 %v2413_v39  ;;  %1265 = vmatpush1.bf16.msra.mxu1 %v2415_v40  ;;  %v3001_v40 = vld [vmem:[#allocation24_spill] sm:$0xff] }
 0x47c   :  { %1225 = vmatprep.subr.bf16.mxu0 %v2422_v42  ;;  %1266 = vmatprep.subr.bf16.mxu1 %v2424_v43 }
 0x47f   :  { %1226 = vmatpush1.bf16.msra.mxu0 %v2434_v47  ;;  %1267 = vmatpush1.bf16.msra.mxu1 %v2436_v48 }
 0x480   :  { %1342 = vmatprep.subr.bf16.mxu0 %v2773_v25  ;;  %1383 = vmatprep.subr.bf16.mxu1 %v2776_v26 }
 0x535   :  { %v1114_v28 = vpop.f32.mrb[32].mxu0  ;;  %v1155_v30 = vpop.f32.mrb[32].mxu1 }
 0x536   :  { %v1162_v32 = vadd.f32 %v1114_v28, %v2998_v31  ;;  %v1164_v34 = vadd.f32 %v1155_v30, %v2999_v33  ;;  %v1116_v35 = vpop.f32.mrb[33].mxu0  ;;  %v1157_v36 = vpop.f32.mrb[33].mxu1  ;;  %v2836_v28 = vld [vmem:[#allocation6 + $0xc4] ss:$16 sps:$4 sm:$0xff]   ;;  %v2839_v30 = vld [vmem:[#allocation6 + $0xcc] ss:$16 sps:$4 sm:$0xff]  }
 0x537   :  { %v1163_v39 = vadd.f32 %v1116_v35, %v3000_v38  ;;  %v1165_v42 = vadd.f32 %v1157_v36, %v3001_v40  ;;  %v1118_v43 = vpop.f32.mrb[34].mxu0  ;;  %v1159_v47 = vpop.f32.mrb[34].mxu1  ;;  %v2842_v31 = vld [vmem:[#allocation6 + $0xc0] ss:$16 sps:$4 sm:$0xff]   ;;  %v2848_v33 = vld [vmem:[#allocation6 + $0xe4] ss:$16 sps:$4 sm:$0xff]  }
 0x538   :  { %v1824_v48 = vmul.f32 -1.442695, %v1162_v32  ;;  %v1119_v21 = vpop.f32.mrb[35].mxu0  ;;  %v1160_v41 = vpop.f32.mrb[35].mxu1  ;;  %v1826_v23 = vmul.f32 -1.442695, %v1164_v34 }
 0x539   :  { %v1825_v22 = vmul.f32 -1.442695, %v1163_v39  ;;  %v2845_v32 = vld [vmem:[#allocation6 + $0xc8] ss:$16 sps:$4 sm:$0xff]   ;;  %v2851_v34 = vld [vmem:[#allocation6 + $0xec] ss:$16 sps:$4 sm:$0xff]  }
 0x53a   :  { %2037 = vpow2.f32 %v1824_v48  ;;  %v2854_v35 = vld [vmem:[#allocation6 + $0xe0] ss:$16 sps:$4 sm:$0xff]   ;;  %v2857_v36 = vld [vmem:[#allocation6 + $0xe8] ss:$16 sps:$4 sm:$0xff]  }
 0x53b   :  { %2039 = vpow2.f32 %v1825_v22  ;;  %v2865_v38 = vld [vmem:[%s2957_s1] sm:$0xff]  ;;  %v3002_v43 = vld [vmem:[#allocation25_spill] sm:$0xff]  ;;  %v3004_v22 = vld [vmem:[#allocation27_spill] sm:$0xff] }
 0x53c   :  { %2041 = vtanh.f32 %v1165_v42  ;;  %vm1837_vm7 = vcmp.gt.f32.partialorder %v2865_v38, 6.0  ;;  %v3003_v48 = vld [vmem:[#allocation26_spill] sm:$0xff]  ;;  %vm1842_vm8 = vcmp.gt.f32.partialorder %v2865_v38, 7.0 }
 0x53d   :  { %2043 = vpow2.f32 %v1826_v23  ;;  %v1838_v39 = vsel %vm1837_vm7, 1.0, %v2991_v57  ;;  %v3005_v23 = vld [vmem:[#allocation28_spill] sm:$0xff] }
 0x53e   :  { %1460 = vperm.xlu1 %1900, %v1838_v39  }
 0x544   :  { %v2038_v24 = vpop.eup %2037 }
 0x545   :  { %v1175_v3 = vadd.f32 1.0, %v2038_v24  ;;  %v2040_v10 = vpop.eup %2039 }
 0x546   :  { %v1176_v2 = vadd.f32 1.0, %v2040_v10  ;;  %v2042_v11 = vpop.eup %2041 }
 0x547   :  { %2045 = vrcp.f32 %v1175_v3  ;;  %v2044_v55 = vpop.eup %2043 }
 0x548   :  { %2047 = vrcp.f32 %v1176_v2  ;;  %v1177_v0 = vadd.f32 1.0, %v2044_v55 }
 0x54a   :  { %2049 = vrcp.f32 %v1177_v0 }
 0x551   :  { %v2046_v19 = vpop.eup %2045 }
 0x552   :  { %v1186_v6 = vmul.f32 %v2046_v19, %v2042_v11  ;;  %v2048_v56 = vpop.eup %2047 }
 0x553   :  { %v1185_v54 = vmul.f32 %v2048_v56, %v2711_v63  ;;  %v2809_v63 = vld [vmem:[#allocation6 + $0x68] ss:$16 sps:$4 sm:$0xff]  }
 0x554   :  { %v2050_v50 = vpop.eup %2049 }
 0x555   :  { %v2786_v8 = vadd.f32 %v1186_v6, %v1185_v54 }
 0x557   :  { %2051 = vtanh.f32 %v2786_v8 }
 0x561   :  { %v2052_v59 = vpop.eup %2051 }
 0x562   :  { %v1189_v45 = vmul.f32 %v2052_v59, %v2050_v50 }
 0x564   :  { %v1201_v49 = vmul.f32 %v1199_v58, %v1189_v45  ;;  %v1210_v60 = vpack.c.bf16 %v1189_v45, %v1189_v45 }
 0x566   :  { %v2790_v62 = vadd.f32 %v1201_v49, %v2715_v29  ;;  %1244 = vmatmul.mubr.bf16.vlgmr.msra.gmra.mrb[36].mxu0 %v1210_v60  ;;  %1285 = vmatmul.mubr.bf16.vlgmr.msra.gmra.mrb[36].mxu1 %v1210_v60  ;;  %v2830_v29 = vld [vmem:[#allocation6 + $0xa0] ss:$16 sps:$4 sm:$0xff]  }
 0x567   :  { %1343 = vmatpush1.bf16.msra.mxu0 %v2717_v5  ;;  %1384 = vmatpush1.bf16.msra.mxu1 %v2720_v4 }
 0x568   :  { %1344 = vmatprep.subr.bf16.mxu0 %v2723_v7  ;;  %1385 = vmatprep.subr.bf16.mxu1 %v2726_v12 }
 0x569   :  { %1374 = vmatprep.mubr.bf16.mxu0 %v2990_v46  ;;  %1415 = vmatprep.mubr.bf16.mxu1 %v2990_v46 }
 0x56b   :  { %1345 = vmatpush1.bf16.msra.mxu0 %v2731_v9  ;;  %1386 = vmatpush1.bf16.msra.mxu1 %v2734_v13 }
 0x56c   :  { %1346 = vmatprep.subr.bf16.mxu0 %v2737_v14  ;;  %1387 = vmatprep.subr.bf16.mxu1 %v2740_v15 }
 0x56f   :  { %1347 = vmatpush1.bf16.msra.mxu0 %v2743_v16  ;;  %1388 = vmatpush1.bf16.msra.mxu1 %v2746_v17 }
 0x570   :  { %1348 = vmatprep.subr.bf16.mxu0 %v2749_v18  ;;  %1389 = vmatprep.subr.bf16.mxu1 %v2752_v20 }
 0x573   :  { %1349 = vmatpush1.bf16.msra.mxu0 %v2806_v61  ;;  %1390 = vmatpush1.bf16.msra.mxu1 %v2809_v63 }
 0x574   :  { %1350 = vmatprep.subr.bf16.mxu0 %v2812_v1  ;;  %1391 = vmatprep.subr.bf16.mxu1 %v2815_v51 }
 0x577   :  { %1351 = vmatpush1.bf16.msra.mxu0 %v2818_v52  ;;  %1392 = vmatpush1.bf16.msra.mxu1 %v2821_v44 }
 0x578   :  { %1352 = vmatprep.subr.bf16.mxu0 %v2824_v53  ;;  %1393 = vmatprep.subr.bf16.mxu1 %v2827_v37 }
 0x57b   :  { %1353 = vmatpush1.bf16.msra.mxu0 %v2830_v29  ;;  %1394 = vmatpush1.bf16.msra.mxu1 %v2833_v27 }
 0x57c   :  { %1354 = vmatprep.subr.bf16.mxu0 %v2836_v28  ;;  %1395 = vmatprep.subr.bf16.mxu1 %v2839_v30 }
 0x57f   :  { %1355 = vmatpush1.bf16.msra.mxu0 %v2842_v31  ;;  %1396 = vmatpush1.bf16.msra.mxu1 %v2845_v32 }
 0x580   :  { %1356 = vmatprep.subr.bf16.mxu0 %v2848_v33  ;;  %1397 = vmatprep.subr.bf16.mxu1 %v2851_v34 }
 0x583   :  { %1357 = vmatpush1.bf16.msra.mxu0 %v2854_v35  ;;  %1398 = vmatpush1.bf16.msra.mxu1 %v2857_v36 }
 0x584   :  { %1473 = vmatprep.subr.bf16.mxu0 %v2773_v25  ;;  %1514 = vmatprep.subr.bf16.mxu1 %v2776_v26 }
 0x639   :  { %v1245_v40 = vpop.f32.mrb[36].mxu0  ;;  %v1286_v42 = vpop.f32.mrb[36].mxu1 }
 0x63a   :  { %v1293_v47 = vadd.f32 %v1245_v40, %v3002_v43  ;;  %v1295_v21 = vadd.f32 %v1286_v42, %v3003_v48  ;;  %v1247_v41 = vpop.f32.mrb[37].mxu0  ;;  %v1288_v25 = vpop.f32.mrb[37].mxu1 }
 0x63b   :  { %v1294_v26 = vadd.f32 %v1247_v41, %v3004_v22  ;;  %v1296_v24 = vadd.f32 %v1288_v25, %v3005_v23  ;;  %v1249_v3 = vpop.f32.mrb[38].mxu0  ;;  %v1290_v10 = vpop.f32.mrb[38].mxu1 }
 0x63c   :  { %v1829_v2 = vmul.f32 -1.442695, %v1293_v47  ;;  %v1250_v11 = vpop.f32.mrb[39].mxu0  ;;  %v1291_v55 = vpop.f32.mrb[39].mxu1  ;;  %v1831_v6 = vmul.f32 -1.442695, %v1295_v21 }
 0x63d   :  { %v1830_v19 = vmul.f32 -1.442695, %v1294_v26  ;;  %v1330_v48 = vpop.permute.xlu0 %1329  ;;  %v1461_v23 = vpop.permute.xlu1 %1460  ;;  %v1965_v11 = vld [vmem:[#allocation9] sm:$0xff]   ;;  %v1966_v55 = vld [vmem:[#allocation9 + $0x8] sm:$0xff]  }
 0x63e   :  { %2053 = vpow2.f32 %v1829_v2 }
 0x63f   :  { %2055 = vpow2.f32 %v1830_v19  ;;  %v1967_v19 = vld [vmem:[#allocation9 + $0x10] sm:$0xff]  }
 0x640   :  { %2057 = vtanh.f32 %v1296_v24 }
 0x641   :  { %2059 = vpow2.f32 %v1831_v6  ;;  %v1968_v6 = vld [vmem:[#allocation9 + $0x18] sm:$0xff]  }
 0x648   :  { %v2054_v56 = vpop.eup %2053 }
 0x649   :  { %v1306_v0 = vadd.f32 1.0, %v2054_v56  ;;  %v2056_v54 = vpop.eup %2055  ;;  %v1969_v56 = vld [vmem:[#allocation9 + $0x20] sm:$0xff]  }
 0x64a   :  { %v1307_v50 = vadd.f32 1.0, %v2056_v54  ;;  %v2058_v59 = vpop.eup %2057  ;;  %v1971_v54 = vld [vmem:[#allocation9 + $0x30] sm:$0xff]  }
 0x64b   :  { %2061 = vrcp.f32 %v1306_v0  ;;  %v2060_v58 = vpop.eup %2059  ;;  %v1970_v0 = vld [vmem:[#allocation9 + $0x28] sm:$0xff]  }
 0x64c   :  { %2063 = vrcp.f32 %v1307_v50  ;;  %v1308_v39 = vadd.f32 1.0, %v2060_v58  ;;  %v1972_v50 = vld [vmem:[#allocation9 + $0x38] sm:$0xff]  }
 0x64e   :  { %2065 = vrcp.f32 %v1308_v39 }
 0x655   :  { %v2062_v45 = vpop.eup %2061 }
 0x656   :  { %v1317_v49 = vmul.f32 %v2062_v45, %v2058_v59  ;;  %v2064_v60 = vpop.eup %2063  ;;  %v3010_v45 = vld [vmem:[#allocation33_spill] sm:$0xff] }
 0x657   :  { %v1316_v40 = vmul.f32 %v2064_v60, %v2786_v8  ;;  %v3011_v60 = vld [vmem:[#allocation34_spill] sm:$0xff] }
 0x658   :  { %v2066_v43 = vpop.eup %2065 }
 0x659   :  { %v2874_v42 = vadd.f32 %v1317_v49, %v1316_v40 }
 0x65b   :  { %2067 = vtanh.f32 %v2874_v42 }
 0x65c   :  { %2069 = vrcp.f32 %v2865_v38 }
 0x665   :  { %v2068_v47 = vpop.eup %2067 }
 0x666   :  { %v1320_v21 = vmul.f32 %v2068_v47, %v2066_v43  ;;  %v3012_v43 = vld [vmem:[#allocation35_spill] sm:$0xff] }
 0x668   :  { %v1332_v41 = vmul.f32 %v1330_v48, %v1320_v21  ;;  %v1341_v25 = vpack.c.bf16 %v1320_v21, %v1320_v21  ;;  %v3013_v48 = vld [vmem:[#allocation36_spill] sm:$0xff] }
 0x66a   :  { %v2878_v22 = vadd.f32 %v1332_v41, %v2790_v62  ;;  %1375 = vmatmul.mubr.bf16.vlgmr.msra.gmra.mrb[40].mxu0 %v1341_v25  ;;  %1416 = vmatmul.mubr.bf16.vlgmr.msra.gmra.mrb[40].mxu1 %v1341_v25 }
 0x66b   :  { %1474 = vmatpush1.bf16.msra.mxu0 %v2717_v5  ;;  %1515 = vmatpush1.bf16.msra.mxu1 %v2720_v4  ;;  %v2070_v5 = vpop.eup %2069 }
 0x66c   :  { %1475 = vmatprep.subr.bf16.mxu0 %v2723_v7  ;;  %1516 = vmatprep.subr.bf16.mxu1 %v2726_v12  ;;  %v3006_v12 = vld [vmem:[#allocation29_spill] sm:$0xff] }
 0x66d   :  { %1505 = vmatprep.mubr.bf16.mxu0 %v2990_v46  ;;  %1546 = vmatprep.mubr.bf16.mxu1 %v2990_v46  ;;  %v1843_v46 = vsel %vm1842_vm8, 1.0, %v2991_v57 }
 0x66e   :  { %1591 = vperm.xlu0 %1894, %v1843_v46   ;;  %1606 = vperm.xlu1 %1900, %v2070_v5  }
 0x66f   :  { %1476 = vmatpush1.bf16.msra.mxu0 %v2731_v9  ;;  %1517 = vmatpush1.bf16.msra.mxu1 %v2734_v13  ;;  %v3007_v13 = vld [vmem:[#allocation30_spill] sm:$0xff] }
 0x670   :  { %1477 = vmatprep.subr.bf16.mxu0 %v2737_v14  ;;  %1518 = vmatprep.subr.bf16.mxu1 %v2740_v15 }
 0x673   :  { %1478 = vmatpush1.bf16.msra.mxu0 %v2743_v16  ;;  %1519 = vmatpush1.bf16.msra.mxu1 %v2746_v17  ;;  %v3008_v17 = vld [vmem:[#allocation31_spill] sm:$0xff] }
 0x674   :  { %1479 = vmatprep.subr.bf16.mxu0 %v2749_v18  ;;  %1520 = vmatprep.subr.bf16.mxu1 %v2752_v20  ;;  %v3009_v20 = vld [vmem:[#allocation32_spill] sm:$0xff] }
 0x677   :  { %1480 = vmatpush1.bf16.msra.mxu0 %v2806_v61  ;;  %1521 = vmatpush1.bf16.msra.mxu1 %v2809_v63 }
 0x678   :  { %1481 = vmatprep.subr.bf16.mxu0 %v2812_v1  ;;  %1522 = vmatprep.subr.bf16.mxu1 %v2815_v51 }
 0x67b   :  { %1482 = vmatpush1.bf16.msra.mxu0 %v2818_v52  ;;  %1523 = vmatpush1.bf16.msra.mxu1 %v2821_v44 }
 0x67c   :  { %1483 = vmatprep.subr.bf16.mxu0 %v2824_v53  ;;  %1524 = vmatprep.subr.bf16.mxu1 %v2827_v37 }
 0x67f   :  { %1484 = vmatpush1.bf16.msra.mxu0 %v2830_v29  ;;  %1525 = vmatpush1.bf16.msra.mxu1 %v2833_v27 }
 0x680   :  { %1485 = vmatprep.subr.bf16.mxu0 %v2836_v28  ;;  %1526 = vmatprep.subr.bf16.mxu1 %v2839_v30 }
 0x683   :  { %1486 = vmatpush1.bf16.msra.mxu0 %v2842_v31  ;;  %1527 = vmatpush1.bf16.msra.mxu1 %v2845_v32 }
 0x684   :  { %1487 = vmatprep.subr.bf16.mxu0 %v2848_v33  ;;  %1528 = vmatprep.subr.bf16.mxu1 %v2851_v34 }
 0x687   :  { %1488 = vmatpush1.bf16.msra.mxu0 %v2854_v35  ;;  %1529 = vmatpush1.bf16.msra.mxu1 %v2857_v36 }
 0x688   :  { %1863 = vmatprep.subr.bf16.mxu0 %v2991_v57 }
 0x73d   :  { %v1376_v4 = vpop.f32.mrb[40].mxu0  ;;  %v1417_v7 = vpop.f32.mrb[40].mxu1 }
 0x73e   :  { %v1424_v9 = vadd.f32 %v1376_v4, %v3006_v12  ;;  %v1426_v14 = vadd.f32 %v1417_v7, %v3007_v13  ;;  %v1378_v15 = vpop.f32.mrb[41].mxu0  ;;  %v1419_v16 = vpop.f32.mrb[41].mxu1 }
 0x73f   :  { %v1425_v18 = vadd.f32 %v1378_v15, %v3008_v17  ;;  %v1427_v8 = vadd.f32 %v1419_v16, %v3009_v20  ;;  %v1380_v62 = vpop.f32.mrb[42].mxu0  ;;  %v1421_v61 = vpop.f32.mrb[42].mxu1 }
 0x740   :  { %v1834_v63 = vmul.f32 -1.442695, %v1424_v9  ;;  %v1381_v1 = vpop.f32.mrb[43].mxu0  ;;  %v1422_v51 = vpop.f32.mrb[43].mxu1  ;;  %v1836_v44 = vmul.f32 -1.442695, %v1426_v14 }
 0x741   :  { %v1835_v52 = vmul.f32 -1.442695, %v1425_v18  ;;  %v1592_v51 = vpop.permute.xlu0 %1591 }
 0x742   :  { %2071 = vpow2.f32 %v1834_v63 }
 0x743   :  { %2073 = vpow2.f32 %v1835_v52 }
 0x744   :  { %2075 = vtanh.f32 %v1427_v8 }
 0x745   :  { %2077 = vpow2.f32 %v1836_v44 }
 0x74c   :  { %v2072_v53 = vpop.eup %2071 }
 0x74d   :  { %v1437_v37 = vadd.f32 1.0, %v2072_v53  ;;  %v2074_v29 = vpop.eup %2073  ;;  %v1607_v53 = vpop.permute.xlu1 %1606 }
 0x74e   :  { %v1438_v27 = vadd.f32 1.0, %v2074_v29  ;;  %v2076_v28 = vpop.eup %2075 }
 0x74f   :  { %2079 = vrcp.f32 %v1437_v37  ;;  %v2078_v30 = vpop.eup %2077 }
 0x750   :  { %2081 = vrcp.f32 %v1438_v27  ;;  %v1439_v34 = vadd.f32 1.0, %v2078_v30  ;;  %v1844_v27 = vld [vmem:[%s2962_s6] ss:$0 sm:$0xff] }
 0x752   :  { %2083 = vrcp.f32 %v1439_v34 }
 0x759   :  { %v2080_v31 = vpop.eup %2079 }
 0x75a   :  { %v1448_v32 = vmul.f32 %v2080_v31, %v2076_v28  ;;  %v2082_v33 = vpop.eup %2081 }
 0x75b   :  { %v1447_v35 = vmul.f32 %v2082_v33, %v2874_v42 }
 0x75c   :  { %v2084_v38 = vpop.eup %2083 }
 0x75d   :  { %v2921_v36 = vadd.f32 %v1448_v32, %v1447_v35 }
 0x75f   :  { %2085 = vtanh.f32 %v2921_v36 }
 0x769   :  { %v2086_v26 = vpop.eup %2085 }
 0x76a   :  { %v1451_v24 = vmul.f32 %v2086_v26, %v2084_v38 }
 0x76c   :  { %v1463_v3 = vmul.f32 %v1461_v23, %v1451_v24  ;;  %v1472_v10 = vpack.c.bf16 %v1451_v24, %v1451_v24 }
 0x76e   :  { %v2925_v2 = vadd.f32 %v1463_v3, %v2878_v22  ;;  %1506 = vmatmul.mubr.bf16.vlgmr.msra.gmra.mrb[44].mxu0 %v1472_v10  ;;  %1547 = vmatmul.mubr.bf16.vlgmr.msra.gmra.mrb[44].mxu1 %v1472_v10 }
 0x76f   :  { %1864 = vmatpush3.bf16.msra.mxu0 %v1965_v11  ;;  %1879 = vmatprep.mubr.msk.bf16.mxu0 %vm2221_vm9, %v2991_v57 }
 0x770   :  { %1865 = vmatprep.subr.bf16.mxu0 %v2991_v57 }
 0x773   :  { %1866 = vmatpush3.bf16.msra.mxu0 %v1966_v55 }
 0x774   :  { %1867 = vmatprep.subr.bf16.mxu0 %v2991_v57 }
 0x777   :  { %1868 = vmatpush3.bf16.msra.mxu0 %v1967_v19 }
 0x778   :  { %1869 = vmatprep.subr.bf16.mxu0 %v2991_v57 }
 0x77b   :  { %1870 = vmatpush3.bf16.msra.mxu0 %v1968_v6 }
 0x77c   :  { %1871 = vmatprep.subr.bf16.mxu0 %v2991_v57 }
 0x77f   :  { %1872 = vmatpush3.bf16.msra.mxu0 %v1969_v56 }
 0x780   :  { %1873 = vmatprep.subr.bf16.mxu0 %v2991_v57 }
 0x783   :  { %1874 = vmatpush3.bf16.msra.mxu0 %v1970_v0 }
 0x784   :  { %1875 = vmatprep.subr.bf16.mxu0 %v2991_v57 }
 0x787   :  { %1876 = vmatpush3.bf16.msra.mxu0 %v1971_v54 }
 0x788   :  { %1877 = vmatprep.subr.bf16.mxu0 %v2991_v57 }
 0x78b   :  { %1878 = vmatpush3.bf16.msra.mxu0 %v1972_v50 }
 0x841   :  { %v1507_v59 = vpop.f32.mrb[44].mxu0  ;;  %v1548_v58 = vpop.f32.mrb[44].mxu1 }
 0x842   :  { %v1555_v49 = vadd.f32 %v1507_v59, %v3010_v45  ;;  %v1557_v39 = vadd.f32 %v1548_v58, %v3011_v60  ;;  %v1509_v40 = vpop.f32.mrb[45].mxu0  ;;  %v1550_v42 = vpop.f32.mrb[45].mxu1 }
 0x843   :  { %v1556_v47 = vadd.f32 %v1509_v40, %v3012_v43  ;;  %v1558_v21 = vadd.f32 %v1550_v42, %v3013_v48  ;;  %v1511_v41 = vpop.f32.mrb[46].mxu0  ;;  %v1552_v25 = vpop.f32.mrb[46].mxu1 }
 0x844   :  { %v1839_v22 = vmul.f32 -1.442695, %v1555_v49  ;;  %v1512_v46 = vpop.f32.mrb[47].mxu0  ;;  %v1553_v5 = vpop.f32.mrb[47].mxu1  ;;  %v1841_v57 = vmul.f32 -1.442695, %v1557_v39 }
 0x845   :  { %v1840_v4 = vmul.f32 -1.442695, %v1556_v47 }
 0x846   :  { %2087 = vpow2.f32 %v1839_v22 }
 0x847   :  { %2089 = vpow2.f32 %v1840_v4 }
 0x848   :  { %2091 = vtanh.f32 %v1558_v21 }
 0x849   :  { %2093 = vpow2.f32 %v1841_v57 }
 0x850   :  { %v2088_v7 = vpop.eup %2087 }
 0x851   :  { %v1568_v12 = vadd.f32 1.0, %v2088_v7  ;;  %v2090_v9 = vpop.eup %2089 }
 0x852   :  { %v1569_v13 = vadd.f32 1.0, %v2090_v9  ;;  %v2092_v14 = vpop.eup %2091 }
 0x853   :  { %2095 = vrcp.f32 %v1568_v12  ;;  %v2094_v15 = vpop.eup %2093 }
 0x854   :  { %2097 = vrcp.f32 %v1569_v13  ;;  %v1570_v20 = vadd.f32 1.0, %v2094_v15 }
 0x856   :  { %2099 = vrcp.f32 %v1570_v20 }
 0x85d   :  { %v2096_v16 = vpop.eup %2095 }
 0x85e   :  { %v1579_v17 = vmul.f32 %v2096_v16, %v2092_v14  ;;  %v2098_v18 = vpop.eup %2097 }
 0x85f   :  { %v1578_v8 = vmul.f32 %v2098_v18, %v2921_v36 }
 0x860   :  { %v2100_v61 = vpop.eup %2099 }
 0x861   :  { %v1580_v62 = vadd.f32 %v1579_v17, %v1578_v8 }
 0x863   :  { %2101 = vtanh.f32 %v1580_v62 }
 0x86d   :  { %v2102_v63 = vpop.eup %2101 }
 0x86e   :  { %v1582_v1 = vmul.f32 %v2102_v63, %v2100_v61 }
 0x870   :  { %v1594_v52 = vmul.f32 %v1592_v51, %v1582_v1 }
 0x872   :  { %v1595_v44 = vadd.f32 %v1594_v52, %v2925_v2 }
 0x874   :  { %v1609_v37 = vmul.f32 %v1607_v53, %v1595_v44 }
 0x876   :  { %v1610_v29 = vpack.c.bf16 %v1609_v37, %v1609_v37 }
 0x878   :  { %1880 = vmatmul.mubr.bf16.vlgmr.msra.gmra.mrb[48].mxu0 %v1610_v29 }
 0x94b   :  { %v1716_v28 = vpop.f32.mrb[48].mxu0 }
 0x94c   :  { %v1717_v30 = vadd.f32 %v1844_v27, %v1716_v28  ;;  %v1881_v31 = vpop.f32.mrb[49].mxu0 }
 0x94d   :  { %v1719_v32 = vpop.f32.mrb[50].mxu0 }
 0x94e   :  { %v1853_v33 = vmul.f32 -1.442695, %v1717_v30  ;;  %v1882_v34 = vpop.f32.mrb[51].mxu0 }
 0x950   :  { %2103 = vpow2.f32 %v1853_v33 }
 0x95a   :  { %v2104_v35 = vpop.eup %2103 }
 0x95b   :  { %v1725_v36 = vadd.f32 1.0, %v2104_v35 }
 0x95d   :  { %2105 = vrcp.f32 %v1725_v36 }
 0x967   :  { %v2106_v38 = vpop.eup %2105 }
 0x968   :  { %1728 = vst [vmem:[#allocation11] sm:$0xff] %v2106_v38 }
 0x969   :  { %2195 = shalt.err (!%p2192_p6)
}
 0x96a   :  { %s2196_s11 = scalar_lea.hbm %s2963_s7, 128 }
 0x96b   :  { %p2197_p7 = scmp.ne.s32.totalorder %s2963_s7, %s2196_s11  ;;  %p2200_p8 = scmp.lt.u32.totalorder %s2196_s11, %s2963_s7 }
 0x96d   :  { %p2202_p9 = pnand %p2200_p8, %p2197_p7 }
 0x96f   :  { %2205 = shalt.err (!%p2202_p9)
}
 0x970   :  { %1738 = dma.vmem_to_hbm [thread:$0]  %s1736_s5, 128, %s2963_s7, [#allocation8]  }
 0x971   :  { %2210 = dma.done.wait [#allocation8], 128  }
 0x972   :  { %2211 = vsyncadd [#allocation8], 4294967168 }
 0x973   :  { %1742 = vsyncpa [#allocation7], 1 }
 0x974   :  { %1743 = vsyncpa [#allocation10], 1 }
 0x975   :  { %1744 = vsyncpa [#allocation8], 1 }

</bundles_post_ra>
